<compile_context>
chip_gen: v5e
topology: v5e:2x2
jax: 0.10.0
libtpu: 0.0.40
codegen_flags: <defaults>
</compile_context>

<pallas_src>
import jax
import jax.numpy as jnp
from jax.experimental import pallas as pl
from jax.experimental.pallas import tpu as pltpu

_NUM_CONV_CH = 8      # Conv1d out_channels
_CONV_K = 5           # Conv1d kernel_size
_PROJ_DIM = 256       # ProjectionHead projection_dim (fixed by fc in_features = 8*126 = 1008)
_HALF = _PROJ_DIM // 2
_POOL_LEN = (_PROJ_DIM - _CONV_K + 1) // 2   # 126


# ----------------------------------------------------------------------------------
# Kernel
# ----------------------------------------------------------------------------------
def _brainclip_cls_kernel(
    img_ref, txt_ref, wimg_ref, wtxt_ref, convw_sm, convb_sm,
    fcw_ref, fcb_ref, onehot_ref,
    probs_ref, loss_ref,
):
    batch = probs_ref.shape[0]
    num_classes = probs_ref.shape[1]

    # ---- ProjectionHead (nn.Linear, bias=False), fused with the conv's "im2col" ----
    # Projection weight columns are pre-arranged host-side so one matmul per modality
    # directly yields the 6 bases [even(p), odd(p), even(p+1), odd(p+1), even(p+2),
    # odd(p+2)] of the projected 256-d feature, where even(j) = feat[2j], odd(j) = feat[2j+1].
    img_basis = jnp.dot(img_ref[...], wimg_ref[...], preferred_element_type=jnp.float32)
    txt_basis = jnp.dot(txt_ref[...], wtxt_ref[...], preferred_element_type=jnp.float32)

    def split6(b):
        return tuple(b[:, i * _HALF:(i + 1) * _HALF] for i in range(6))

    bases = (split6(img_basis), split6(txt_basis))   # conv in-channel 0 = image, 1 = text

    # ---- Conv1d(2, 8, 5) -> ReLU -> MaxPool1d(2) -> Flatten -> Linear(1008, nc) ----
    acc = jnp.zeros((batch, num_classes), jnp.float32)
    for o in range(_NUM_CONV_CH):
        ce = convb_sm[o]      # conv output at even positions t = 2p
        co = convb_sm[o]      # conv output at odd  positions t = 2p + 1
        for c in range(2):
            e0, o0, e1, o1, e2, o2 = bases[c]
            w = [convw_sm[(o * 2 + c) * _CONV_K + k] for k in range(_CONV_K)]
            ce = ce + w[0] * e0 + w[1] * o0 + w[2] * e1 + w[3] * o1 + w[4] * e2
            co = co + w[0] * o0 + w[1] * e1 + w[2] * o1 + w[3] * e2 + w[4] * o2
        # ReLU(MaxPool1d(2)) == max(relu(even), relu(odd)) (ReLU is monotonic).
        # Lanes >= 126 are don't-care: they hit zero-padded fc weights below.
        pooled = jnp.maximum(jnp.maximum(ce, co), 0.0)                     # (B, 128)
        acc = acc + jnp.dot(pooled, fcw_ref[o], preferred_element_type=jnp.float32)

    logits = acc + fcb_ref[...]                                            # (B, nc)

    # ---- Softmax(dim=1) -------------------------------------------------------------
    m = jnp.max(logits, axis=-1, keepdims=True)
    e = jnp.exp(logits - m)
    probs = e / jnp.sum(e, axis=-1, keepdims=True)
    probs_ref[...] = probs

    # ---- classification_loss: CrossEntropyLoss applied to the softmax output ---------
    m2 = jnp.max(probs, axis=-1, keepdims=True)
    lse = m2 + jnp.log(jnp.sum(jnp.exp(probs - m2), axis=-1, keepdims=True))
    log_sm = probs - lse
    per_sample = -jnp.sum(onehot_ref[...] * log_sm, axis=-1, keepdims=True)  # (B, 1)
    loss_ref[...] = jnp.sum(per_sample, axis=0, keepdims=True) * (1.0 / batch)


# ----------------------------------------------------------------------------------
# Host-side weight repacking (pure layout transforms, done once under jit)
# ----------------------------------------------------------------------------------
def _pack_projection_weight(w):
    """w: PyTorch nn.Linear weight (proj_dim=256, emb_dim). Returns (emb_dim, 6*128)."""
    w_t = w.T                               # (E, 256): y = x @ w_t
    even = w_t[:, 0::2]                     # column j -> projected feature 2j
    odd = w_t[:, 1::2]                      # column j -> projected feature 2j+1

    def shift(cols, s):                     # column j -> feature at index j+s (zero-pad tail)
        pad = jnp.zeros((cols.shape[0], s), cols.dtype)
        return jnp.concatenate([cols[:, s:], pad], axis=1)

    return jnp.concatenate(
        [even, odd, shift(even, 1), shift(odd, 1), shift(even, 2), shift(odd, 2)], axis=1)


def _pack_fc_weight(fc_w):
    """fc_w: (num_classes, 1008) with flatten index o*126+p. Returns (8, 128, nc), p zero-padded."""
    nc = fc_w.shape[0]
    w = fc_w.reshape(nc, _NUM_CONV_CH, _POOL_LEN)     # [n, o, p]
    w = jnp.transpose(w, (1, 2, 0))                   # (8, 126, nc)
    return jnp.pad(w, ((0, 0), (0, _HALF - _POOL_LEN), (0, 0)))


# ----------------------------------------------------------------------------------
# Forward wrapper
# ----------------------------------------------------------------------------------
@jax.jit
def brainclip_classifier_forward(img_feat, txt_feat, w_img, w_txt,
                                 conv_w, conv_b, fc_w, fc_b, label_onehot):
    batch = img_feat.shape[0]
    num_classes = fc_w.shape[0]

    wimg_packed = _pack_projection_weight(w_img)          # (E_img, 768)
    wtxt_packed = _pack_projection_weight(w_txt)          # (E_txt, 768)
    convw_flat = conv_w.reshape(-1)                       # (80,)  index (o*2+c)*5+k
    fcw_packed = _pack_fc_weight(fc_w)                    # (8, 128, nc)
    fcb = fc_b.reshape(1, num_classes)

    vmem = pl.BlockSpec(memory_space=pltpu.MemorySpace.VMEM)
    smem = pl.BlockSpec(memory_space=pltpu.MemorySpace.SMEM)

    probs, loss = pl.pallas_call(
        _brainclip_cls_kernel,
        out_shape=(
            jax.ShapeDtypeStruct((batch, num_classes), jnp.float32),
            jax.ShapeDtypeStruct((1, 1), jnp.float32),
        ),
        in_specs=[
            vmem,   # img_feat  (B, E_img)
            vmem,   # txt_feat  (B, E_txt)
            vmem,   # packed image projection weight (E_img, 768)
            vmem,   # packed text  projection weight (E_txt, 768)
            smem,   # conv weight scalars (80,)
            smem,   # conv bias scalars (8,)
            vmem,   # packed fc weight (8, 128, nc)
            vmem,   # fc bias (1, nc)
            vmem,   # one-hot labels (B, nc)
        ],
        out_specs=(vmem, vmem),
    )(img_feat, txt_feat, wimg_packed, wtxt_packed, convw_flat, conv_b,
      fcw_packed, fcb, label_onehot)
    return probs, loss


# ----------------------------------------------------------------------------------
# Pure-JAX reference (mirrors the PyTorch module op-for-op)
# ----------------------------------------------------------------------------------
def _reference_forward(img_feat, txt_feat, w_img, w_txt, conv_w, conv_b, fc_w, fc_b, labels):
    hp = jax.lax.Precision.HIGHEST
    wi = jnp.dot(img_feat, w_img.T, precision=hp)
    wt = jnp.dot(txt_feat, w_txt.T, precision=hp)
    feats = jnp.stack([wi, wt], axis=1)                                   # (B, 2, 256)
    windows = jnp.stack(
        [feats[:, :, k:k + (_PROJ_DIM - _CONV_K + 1)] for k in range(_CONV_K)], axis=-1)
    conv = jnp.einsum('bctk,ock->bot', windows, conv_w, precision=hp) + conv_b[None, :, None]
    x = jnp.maximum(conv, 0.0)
    x = x.reshape(x.shape[0], _NUM_CONV_CH, _POOL_LEN, 2).max(axis=-1)
    x = x.reshape(x.shape[0], -1)                                         # (B, 1008)
    logits = jnp.dot(x, fc_w.T, precision=hp) + fc_b
    probs = jax.nn.softmax(logits, axis=1)
    log_sm = jax.nn.log_softmax(probs, axis=1)
    loss = -jnp.mean(log_sm[jnp.arange(x.shape[0]), labels])
    return probs, loss


if __name__ == "__main__":
    batch = 4
    emb_img, emb_txt = 128, 64
    num_classes = 5   # ['infarct', 'tumor', 'hemorrhage', 'normal', 'others']

    key = jax.random.PRNGKey(0)
    k = jax.random.split(key, 8)

    img_feat = jax.random.normal(k[0], (batch, emb_img), jnp.float32)
    txt_feat = jax.random.normal(k[1], (batch, emb_txt), jnp.float32)

    def linear_w(kk, out_f, in_f):
        b = 1.0 / (in_f ** 0.5)
        return jax.random.uniform(kk, (out_f, in_f), jnp.float32, -b, b)

    w_img = linear_w(k[2], _PROJ_DIM, emb_img)       # PyTorch Linear weight layout
    w_txt = linear_w(k[3], _PROJ_DIM, emb_txt)

    cb = 1.0 / ((2 * _CONV_K) ** 0.5)
    conv_w = jax.random.uniform(k[4], (_NUM_CONV_CH, 2, _CONV_K), jnp.float32, -cb, cb)
    conv_b = jax.random.uniform(k[5], (_NUM_CONV_CH,), jnp.float32, -cb, cb)

    fb = 1.0 / (1008 ** 0.5)
    fc_w = jax.random.uniform(k[6], (num_classes, 1008), jnp.float32, -fb, fb)
    fc_b = jax.random.uniform(k[7], (num_classes,), jnp.float32, -fb, fb)

    labels = jnp.array([0, 2, 1, 4], dtype=jnp.int32)[:batch]
    onehot = jax.nn.one_hot(labels, num_classes, dtype=jnp.float32)

    probs, loss = brainclip_classifier_forward(
        img_feat, txt_feat, w_img, w_txt, conv_w, conv_b, fc_w, fc_b, onehot)
    jax.block_until_ready((probs, loss))

    probs_ref, loss_ref = _reference_forward(
        img_feat, txt_feat, w_img, w_txt, conv_w, conv_b, fc_w, fc_b, labels)

    assert probs.shape == (batch, num_classes)
    assert loss.shape == (1, 1)
    assert jnp.allclose(probs, probs_ref, atol=2e-3, rtol=2e-3), "probs mismatch vs reference"
    assert jnp.allclose(loss[0, 0], loss_ref, atol=2e-3, rtol=2e-3), "loss mismatch vs reference"

    print("KERNEL_OK")
</pallas_src>

<mosaic_0001>
module attributes {stable_mosaic.version = 11 : i64} {
  func.func @_brainclip_cls_kernel(%arg0: memref<4x128xf32, #tpu.memory_space<vmem>>, %arg1: memref<4x64xf32, #tpu.memory_space<vmem>>, %arg2: memref<128x768xf32, #tpu.memory_space<vmem>>, %arg3: memref<64x768xf32, #tpu.memory_space<vmem>>, %arg4: memref<80xf32, #tpu.memory_space<smem>>, %arg5: memref<8xf32, #tpu.memory_space<smem>>, %arg6: memref<8x128x5xf32, #tpu.memory_space<vmem>>, %arg7: memref<1x5xf32, #tpu.memory_space<vmem>>, %arg8: memref<4x5xf32, #tpu.memory_space<vmem>>, %arg9: memref<4x5xf32, #tpu.memory_space<vmem>>, %arg10: memref<1x1xf32, #tpu.memory_space<vmem>>) attributes {dimension_semantics = [], scalar_prefetch = 0 : i64, scratch_operands = 0 : i64, tpu.core_type = #tpu.core_type<tc>} {
    %c0 = arith.constant 0 : index
    %c0_0 = arith.constant 0 : index
    %0 = vector.load %arg0[%c0, %c0_0] : memref<4x128xf32, #tpu.memory_space<vmem>>, vector<4x128xf32>
    %c0_1 = arith.constant 0 : index
    %c0_2 = arith.constant 0 : index
    %1 = vector.load %arg2[%c0_1, %c0_2] : memref<128x768xf32, #tpu.memory_space<vmem>>, vector<128x768xf32>
    %cst = arith.constant dense<0.000000e+00> : vector<4x768xf32>
    %2 = tpu.matmul %0, %1, %cst {dimension_numbers = #tpu.dot_dimension_numbers<[1], [0], [0], [1], [0, 0, 1, 1], [], []>} : vector<4x128xf32>, vector<128x768xf32>, vector<4x768xf32> -> vector<4x768xf32>
    %c0_3 = arith.constant 0 : index
    %c0_4 = arith.constant 0 : index
    %3 = vector.load %arg1[%c0_3, %c0_4] : memref<4x64xf32, #tpu.memory_space<vmem>>, vector<4x64xf32>
    %c0_5 = arith.constant 0 : index
    %c0_6 = arith.constant 0 : index
    %4 = vector.load %arg3[%c0_5, %c0_6] : memref<64x768xf32, #tpu.memory_space<vmem>>, vector<64x768xf32>
    %cst_7 = arith.constant dense<0.000000e+00> : vector<4x768xf32>
    %5 = tpu.matmul %3, %4, %cst_7 {dimension_numbers = #tpu.dot_dimension_numbers<[1], [0], [0], [1], [0, 0, 1, 1], [], []>} : vector<4x64xf32>, vector<64x768xf32>, vector<4x768xf32> -> vector<4x768xf32>
    %6 = vector.extract_strided_slice %2 {offsets = [0, 0], sizes = [4, 128], strides = [1, 1]} : vector<4x768xf32> to vector<4x128xf32>
    %7 = vector.extract_strided_slice %2 {offsets = [0, 128], sizes = [4, 128], strides = [1, 1]} : vector<4x768xf32> to vector<4x128xf32>
    %8 = vector.extract_strided_slice %2 {offsets = [0, 256], sizes = [4, 128], strides = [1, 1]} : vector<4x768xf32> to vector<4x128xf32>
    %9 = vector.extract_strided_slice %2 {offsets = [0, 384], sizes = [4, 128], strides = [1, 1]} : vector<4x768xf32> to vector<4x128xf32>
    %10 = vector.extract_strided_slice %2 {offsets = [0, 512], sizes = [4, 128], strides = [1, 1]} : vector<4x768xf32> to vector<4x128xf32>
    %11 = vector.extract_strided_slice %2 {offsets = [0, 640], sizes = [4, 128], strides = [1, 1]} : vector<4x768xf32> to vector<4x128xf32>
    %12 = vector.extract_strided_slice %5 {offsets = [0, 0], sizes = [4, 128], strides = [1, 1]} : vector<4x768xf32> to vector<4x128xf32>
    %13 = vector.extract_strided_slice %5 {offsets = [0, 128], sizes = [4, 128], strides = [1, 1]} : vector<4x768xf32> to vector<4x128xf32>
    %14 = vector.extract_strided_slice %5 {offsets = [0, 256], sizes = [4, 128], strides = [1, 1]} : vector<4x768xf32> to vector<4x128xf32>
    %15 = vector.extract_strided_slice %5 {offsets = [0, 384], sizes = [4, 128], strides = [1, 1]} : vector<4x768xf32> to vector<4x128xf32>
    %16 = vector.extract_strided_slice %5 {offsets = [0, 512], sizes = [4, 128], strides = [1, 1]} : vector<4x768xf32> to vector<4x128xf32>
    %17 = vector.extract_strided_slice %5 {offsets = [0, 640], sizes = [4, 128], strides = [1, 1]} : vector<4x768xf32> to vector<4x128xf32>
    %cst_8 = arith.constant 0.000000e+00 : f32
    %18 = vector.broadcast %cst_8 : f32 to vector<4x5xf32>
    %c0_9 = arith.constant 0 : index
    %19 = memref.load %arg5[%c0_9] : memref<8xf32, #tpu.memory_space<smem>>
    %c0_10 = arith.constant 0 : index
    %20 = memref.load %arg5[%c0_10] : memref<8xf32, #tpu.memory_space<smem>>
    %c0_11 = arith.constant 0 : index
    %21 = memref.load %arg4[%c0_11] : memref<80xf32, #tpu.memory_space<smem>>
    %c1 = arith.constant 1 : index
    %22 = memref.load %arg4[%c1] : memref<80xf32, #tpu.memory_space<smem>>
    %c2 = arith.constant 2 : index
    %23 = memref.load %arg4[%c2] : memref<80xf32, #tpu.memory_space<smem>>
    %c3 = arith.constant 3 : index
    %24 = memref.load %arg4[%c3] : memref<80xf32, #tpu.memory_space<smem>>
    %c4 = arith.constant 4 : index
    %25 = memref.load %arg4[%c4] : memref<80xf32, #tpu.memory_space<smem>>
    %26 = vector.broadcast %21 : f32 to vector<4x128xf32>
    %27 = arith.mulf %26, %6 : vector<4x128xf32>
    %28 = vector.broadcast %19 : f32 to vector<4x128xf32>
    %29 = arith.addf %28, %27 : vector<4x128xf32>
    %30 = vector.broadcast %22 : f32 to vector<4x128xf32>
    %31 = arith.mulf %30, %7 : vector<4x128xf32>
    %32 = arith.addf %29, %31 : vector<4x128xf32>
    %33 = vector.broadcast %23 : f32 to vector<4x128xf32>
    %34 = arith.mulf %33, %8 : vector<4x128xf32>
    %35 = arith.addf %32, %34 : vector<4x128xf32>
    %36 = vector.broadcast %24 : f32 to vector<4x128xf32>
    %37 = arith.mulf %36, %9 : vector<4x128xf32>
    %38 = arith.addf %35, %37 : vector<4x128xf32>
    %39 = vector.broadcast %25 : f32 to vector<4x128xf32>
    %40 = arith.mulf %39, %10 : vector<4x128xf32>
    %41 = arith.addf %38, %40 : vector<4x128xf32>
    %42 = vector.broadcast %21 : f32 to vector<4x128xf32>
    %43 = arith.mulf %42, %7 : vector<4x128xf32>
    %44 = vector.broadcast %20 : f32 to vector<4x128xf32>
    %45 = arith.addf %44, %43 : vector<4x128xf32>
    %46 = vector.broadcast %22 : f32 to vector<4x128xf32>
    %47 = arith.mulf %46, %8 : vector<4x128xf32>
    %48 = arith.addf %45, %47 : vector<4x128xf32>
    %49 = vector.broadcast %23 : f32 to vector<4x128xf32>
    %50 = arith.mulf %49, %9 : vector<4x128xf32>
    %51 = arith.addf %48, %50 : vector<4x128xf32>
    %52 = vector.broadcast %24 : f32 to vector<4x128xf32>
    %53 = arith.mulf %52, %10 : vector<4x128xf32>
    %54 = arith.addf %51, %53 : vector<4x128xf32>
    %55 = vector.broadcast %25 : f32 to vector<4x128xf32>
    %56 = arith.mulf %55, %11 : vector<4x128xf32>
    %57 = arith.addf %54, %56 : vector<4x128xf32>
    %c5 = arith.constant 5 : index
    %58 = memref.load %arg4[%c5] : memref<80xf32, #tpu.memory_space<smem>>
    %c6 = arith.constant 6 : index
    %59 = memref.load %arg4[%c6] : memref<80xf32, #tpu.memory_space<smem>>
    %c7 = arith.constant 7 : index
    %60 = memref.load %arg4[%c7] : memref<80xf32, #tpu.memory_space<smem>>
    %c8 = arith.constant 8 : index
    %61 = memref.load %arg4[%c8] : memref<80xf32, #tpu.memory_space<smem>>
    %c9 = arith.constant 9 : index
    %62 = memref.load %arg4[%c9] : memref<80xf32, #tpu.memory_space<smem>>
    %63 = vector.broadcast %58 : f32 to vector<4x128xf32>
    %64 = arith.mulf %63, %12 : vector<4x128xf32>
    %65 = arith.addf %41, %64 : vector<4x128xf32>
    %66 = vector.broadcast %59 : f32 to vector<4x128xf32>
    %67 = arith.mulf %66, %13 : vector<4x128xf32>
    %68 = arith.addf %65, %67 : vector<4x128xf32>
    %69 = vector.broadcast %60 : f32 to vector<4x128xf32>
    %70 = arith.mulf %69, %14 : vector<4x128xf32>
    %71 = arith.addf %68, %70 : vector<4x128xf32>
    %72 = vector.broadcast %61 : f32 to vector<4x128xf32>
    %73 = arith.mulf %72, %15 : vector<4x128xf32>
    %74 = arith.addf %71, %73 : vector<4x128xf32>
    %75 = vector.broadcast %62 : f32 to vector<4x128xf32>
    %76 = arith.mulf %75, %16 : vector<4x128xf32>
    %77 = arith.addf %74, %76 : vector<4x128xf32>
    %78 = vector.broadcast %58 : f32 to vector<4x128xf32>
    %79 = arith.mulf %78, %13 : vector<4x128xf32>
    %80 = arith.addf %57, %79 : vector<4x128xf32>
    %81 = vector.broadcast %59 : f32 to vector<4x128xf32>
    %82 = arith.mulf %81, %14 : vector<4x128xf32>
    %83 = arith.addf %80, %82 : vector<4x128xf32>
    %84 = vector.broadcast %60 : f32 to vector<4x128xf32>
    %85 = arith.mulf %84, %15 : vector<4x128xf32>
    %86 = arith.addf %83, %85 : vector<4x128xf32>
    %87 = vector.broadcast %61 : f32 to vector<4x128xf32>
    %88 = arith.mulf %87, %16 : vector<4x128xf32>
    %89 = arith.addf %86, %88 : vector<4x128xf32>
    %90 = vector.broadcast %62 : f32 to vector<4x128xf32>
    %91 = arith.mulf %90, %17 : vector<4x128xf32>
    %92 = arith.addf %89, %91 : vector<4x128xf32>
    %93 = arith.maximumf %77, %92 : vector<4x128xf32>
    %cst_12 = arith.constant 0.000000e+00 : f32
    %94 = vector.broadcast %cst_12 : f32 to vector<4x128xf32>
    %95 = arith.maximumf %93, %94 : vector<4x128xf32>
    %c0_13 = arith.constant 0 : index
    %c0_14 = arith.constant 0 : index
    %c0_15 = arith.constant 0 : index
    %96 = vector.load %arg6[%c0_13, %c0_14, %c0_15] : memref<8x128x5xf32, #tpu.memory_space<vmem>>, vector<1x128x5xf32>
    %97 = vector.shape_cast %96 : vector<1x128x5xf32> to vector<128x5xf32>
    %cst_16 = arith.constant dense<0.000000e+00> : vector<4x5xf32>
    %98 = tpu.matmul %95, %97, %cst_16 {dimension_numbers = #tpu.dot_dimension_numbers<[1], [0], [0], [1], [0, 0, 1, 1], [], []>} : vector<4x128xf32>, vector<128x5xf32>, vector<4x5xf32> -> vector<4x5xf32>
    %99 = arith.addf %18, %98 : vector<4x5xf32>
    %c1_17 = arith.constant 1 : index
    %100 = memref.load %arg5[%c1_17] : memref<8xf32, #tpu.memory_space<smem>>
    %c1_18 = arith.constant 1 : index
    %101 = memref.load %arg5[%c1_18] : memref<8xf32, #tpu.memory_space<smem>>
    %c10 = arith.constant 10 : index
    %102 = memref.load %arg4[%c10] : memref<80xf32, #tpu.memory_space<smem>>
    %c11 = arith.constant 11 : index
    %103 = memref.load %arg4[%c11] : memref<80xf32, #tpu.memory_space<smem>>
    %c12 = arith.constant 12 : index
    %104 = memref.load %arg4[%c12] : memref<80xf32, #tpu.memory_space<smem>>
    %c13 = arith.constant 13 : index
    %105 = memref.load %arg4[%c13] : memref<80xf32, #tpu.memory_space<smem>>
    %c14 = arith.constant 14 : index
    %106 = memref.load %arg4[%c14] : memref<80xf32, #tpu.memory_space<smem>>
    %107 = vector.broadcast %102 : f32 to vector<4x128xf32>
    %108 = arith.mulf %107, %6 : vector<4x128xf32>
    %109 = vector.broadcast %100 : f32 to vector<4x128xf32>
    %110 = arith.addf %109, %108 : vector<4x128xf32>
    %111 = vector.broadcast %103 : f32 to vector<4x128xf32>
    %112 = arith.mulf %111, %7 : vector<4x128xf32>
    %113 = arith.addf %110, %112 : vector<4x128xf32>
    %114 = vector.broadcast %104 : f32 to vector<4x128xf32>
    %115 = arith.mulf %114, %8 : vector<4x128xf32>
    %116 = arith.addf %113, %115 : vector<4x128xf32>
    %117 = vector.broadcast %105 : f32 to vector<4x128xf32>
    %118 = arith.mulf %117, %9 : vector<4x128xf32>
    %119 = arith.addf %116, %118 : vector<4x128xf32>
    %120 = vector.broadcast %106 : f32 to vector<4x128xf32>
    %121 = arith.mulf %120, %10 : vector<4x128xf32>
    %122 = arith.addf %119, %121 : vector<4x128xf32>
    %123 = vector.broadcast %102 : f32 to vector<4x128xf32>
    %124 = arith.mulf %123, %7 : vector<4x128xf32>
    %125 = vector.broadcast %101 : f32 to vector<4x128xf32>
    %126 = arith.addf %125, %124 : vector<4x128xf32>
    %127 = vector.broadcast %103 : f32 to vector<4x128xf32>
    %128 = arith.mulf %127, %8 : vector<4x128xf32>
    %129 = arith.addf %126, %128 : vector<4x128xf32>
    %130 = vector.broadcast %104 : f32 to vector<4x128xf32>
    %131 = arith.mulf %130, %9 : vector<4x128xf32>
    %132 = arith.addf %129, %131 : vector<4x128xf32>
    %133 = vector.broadcast %105 : f32 to vector<4x128xf32>
    %134 = arith.mulf %133, %10 : vector<4x128xf32>
    %135 = arith.addf %132, %134 : vector<4x128xf32>
    %136 = vector.broadcast %106 : f32 to vector<4x128xf32>
    %137 = arith.mulf %136, %11 : vector<4x128xf32>
    %138 = arith.addf %135, %137 : vector<4x128xf32>
    %c15 = arith.constant 15 : index
    %139 = memref.load %arg4[%c15] : memref<80xf32, #tpu.memory_space<smem>>
    %c16 = arith.constant 16 : index
    %140 = memref.load %arg4[%c16] : memref<80xf32, #tpu.memory_space<smem>>
    %c17 = arith.constant 17 : index
    %141 = memref.load %arg4[%c17] : memref<80xf32, #tpu.memory_space<smem>>
    %c18 = arith.constant 18 : index
    %142 = memref.load %arg4[%c18] : memref<80xf32, #tpu.memory_space<smem>>
    %c19 = arith.constant 19 : index
    %143 = memref.load %arg4[%c19] : memref<80xf32, #tpu.memory_space<smem>>
    %144 = vector.broadcast %139 : f32 to vector<4x128xf32>
    %145 = arith.mulf %144, %12 : vector<4x128xf32>
    %146 = arith.addf %122, %145 : vector<4x128xf32>
    %147 = vector.broadcast %140 : f32 to vector<4x128xf32>
    %148 = arith.mulf %147, %13 : vector<4x128xf32>
    %149 = arith.addf %146, %148 : vector<4x128xf32>
    %150 = vector.broadcast %141 : f32 to vector<4x128xf32>
    %151 = arith.mulf %150, %14 : vector<4x128xf32>
    %152 = arith.addf %149, %151 : vector<4x128xf32>
    %153 = vector.broadcast %142 : f32 to vector<4x128xf32>
    %154 = arith.mulf %153, %15 : vector<4x128xf32>
    %155 = arith.addf %152, %154 : vector<4x128xf32>
    %156 = vector.broadcast %143 : f32 to vector<4x128xf32>
    %157 = arith.mulf %156, %16 : vector<4x128xf32>
    %158 = arith.addf %155, %157 : vector<4x128xf32>
    %159 = vector.broadcast %139 : f32 to vector<4x128xf32>
    %160 = arith.mulf %159, %13 : vector<4x128xf32>
    %161 = arith.addf %138, %160 : vector<4x128xf32>
    %162 = vector.broadcast %140 : f32 to vector<4x128xf32>
    %163 = arith.mulf %162, %14 : vector<4x128xf32>
    %164 = arith.addf %161, %163 : vector<4x128xf32>
    %165 = vector.broadcast %141 : f32 to vector<4x128xf32>
    %166 = arith.mulf %165, %15 : vector<4x128xf32>
    %167 = arith.addf %164, %166 : vector<4x128xf32>
    %168 = vector.broadcast %142 : f32 to vector<4x128xf32>
    %169 = arith.mulf %168, %16 : vector<4x128xf32>
    %170 = arith.addf %167, %169 : vector<4x128xf32>
    %171 = vector.broadcast %143 : f32 to vector<4x128xf32>
    %172 = arith.mulf %171, %17 : vector<4x128xf32>
    %173 = arith.addf %170, %172 : vector<4x128xf32>
    %174 = arith.maximumf %158, %173 : vector<4x128xf32>
    %cst_19 = arith.constant 0.000000e+00 : f32
    %175 = vector.broadcast %cst_19 : f32 to vector<4x128xf32>
    %176 = arith.maximumf %174, %175 : vector<4x128xf32>
    %c1_20 = arith.constant 1 : index
    %c0_21 = arith.constant 0 : index
    %c0_22 = arith.constant 0 : index
    %177 = vector.load %arg6[%c1_20, %c0_21, %c0_22] : memref<8x128x5xf32, #tpu.memory_space<vmem>>, vector<1x128x5xf32>
    %178 = vector.shape_cast %177 : vector<1x128x5xf32> to vector<128x5xf32>
    %cst_23 = arith.constant dense<0.000000e+00> : vector<4x5xf32>
    %179 = tpu.matmul %176, %178, %cst_23 {dimension_numbers = #tpu.dot_dimension_numbers<[1], [0], [0], [1], [0, 0, 1, 1], [], []>} : vector<4x128xf32>, vector<128x5xf32>, vector<4x5xf32> -> vector<4x5xf32>
    %180 = arith.addf %99, %179 : vector<4x5xf32>
    %c2_24 = arith.constant 2 : index
    %181 = memref.load %arg5[%c2_24] : memref<8xf32, #tpu.memory_space<smem>>
    %c2_25 = arith.constant 2 : index
    %182 = memref.load %arg5[%c2_25] : memref<8xf32, #tpu.memory_space<smem>>
    %c20 = arith.constant 20 : index
    %183 = memref.load %arg4[%c20] : memref<80xf32, #tpu.memory_space<smem>>
    %c21 = arith.constant 21 : index
    %184 = memref.load %arg4[%c21] : memref<80xf32, #tpu.memory_space<smem>>
    %c22 = arith.constant 22 : index
    %185 = memref.load %arg4[%c22] : memref<80xf32, #tpu.memory_space<smem>>
    %c23 = arith.constant 23 : index
    %186 = memref.load %arg4[%c23] : memref<80xf32, #tpu.memory_space<smem>>
    %c24 = arith.constant 24 : index
    %187 = memref.load %arg4[%c24] : memref<80xf32, #tpu.memory_space<smem>>
    %188 = vector.broadcast %183 : f32 to vector<4x128xf32>
    %189 = arith.mulf %188, %6 : vector<4x128xf32>
    %190 = vector.broadcast %181 : f32 to vector<4x128xf32>
    %191 = arith.addf %190, %189 : vector<4x128xf32>
    %192 = vector.broadcast %184 : f32 to vector<4x128xf32>
    %193 = arith.mulf %192, %7 : vector<4x128xf32>
    %194 = arith.addf %191, %193 : vector<4x128xf32>
    %195 = vector.broadcast %185 : f32 to vector<4x128xf32>
    %196 = arith.mulf %195, %8 : vector<4x128xf32>
    %197 = arith.addf %194, %196 : vector<4x128xf32>
    %198 = vector.broadcast %186 : f32 to vector<4x128xf32>
    %199 = arith.mulf %198, %9 : vector<4x128xf32>
    %200 = arith.addf %197, %199 : vector<4x128xf32>
    %201 = vector.broadcast %187 : f32 to vector<4x128xf32>
    %202 = arith.mulf %201, %10 : vector<4x128xf32>
    %203 = arith.addf %200, %202 : vector<4x128xf32>
    %204 = vector.broadcast %183 : f32 to vector<4x128xf32>
    %205 = arith.mulf %204, %7 : vector<4x128xf32>
    %206 = vector.broadcast %182 : f32 to vector<4x128xf32>
    %207 = arith.addf %206, %205 : vector<4x128xf32>
    %208 = vector.broadcast %184 : f32 to vector<4x128xf32>
    %209 = arith.mulf %208, %8 : vector<4x128xf32>
    %210 = arith.addf %207, %209 : vector<4x128xf32>
    %211 = vector.broadcast %185 : f32 to vector<4x128xf32>
    %212 = arith.mulf %211, %9 : vector<4x128xf32>
    %213 = arith.addf %210, %212 : vector<4x128xf32>
    %214 = vector.broadcast %186 : f32 to vector<4x128xf32>
    %215 = arith.mulf %214, %10 : vector<4x128xf32>
    %216 = arith.addf %213, %215 : vector<4x128xf32>
    %217 = vector.broadcast %187 : f32 to vector<4x128xf32>
    %218 = arith.mulf %217, %11 : vector<4x128xf32>
    %219 = arith.addf %216, %218 : vector<4x128xf32>
    %c25 = arith.constant 25 : index
    %220 = memref.load %arg4[%c25] : memref<80xf32, #tpu.memory_space<smem>>
    %c26 = arith.constant 26 : index
    %221 = memref.load %arg4[%c26] : memref<80xf32, #tpu.memory_space<smem>>
    %c27 = arith.constant 27 : index
    %222 = memref.load %arg4[%c27] : memref<80xf32, #tpu.memory_space<smem>>
    %c28 = arith.constant 28 : index
    %223 = memref.load %arg4[%c28] : memref<80xf32, #tpu.memory_space<smem>>
    %c29 = arith.constant 29 : index
    %224 = memref.load %arg4[%c29] : memref<80xf32, #tpu.memory_space<smem>>
    %225 = vector.broadcast %220 : f32 to vector<4x128xf32>
    %226 = arith.mulf %225, %12 : vector<4x128xf32>
    %227 = arith.addf %203, %226 : vector<4x128xf32>
    %228 = vector.broadcast %221 : f32 to vector<4x128xf32>
    %229 = arith.mulf %228, %13 : vector<4x128xf32>
    %230 = arith.addf %227, %229 : vector<4x128xf32>
    %231 = vector.broadcast %222 : f32 to vector<4x128xf32>
    %232 = arith.mulf %231, %14 : vector<4x128xf32>
    %233 = arith.addf %230, %232 : vector<4x128xf32>
    %234 = vector.broadcast %223 : f32 to vector<4x128xf32>
    %235 = arith.mulf %234, %15 : vector<4x128xf32>
    %236 = arith.addf %233, %235 : vector<4x128xf32>
    %237 = vector.broadcast %224 : f32 to vector<4x128xf32>
    %238 = arith.mulf %237, %16 : vector<4x128xf32>
    %239 = arith.addf %236, %238 : vector<4x128xf32>
    %240 = vector.broadcast %220 : f32 to vector<4x128xf32>
    %241 = arith.mulf %240, %13 : vector<4x128xf32>
    %242 = arith.addf %219, %241 : vector<4x128xf32>
    %243 = vector.broadcast %221 : f32 to vector<4x128xf32>
    %244 = arith.mulf %243, %14 : vector<4x128xf32>
    %245 = arith.addf %242, %244 : vector<4x128xf32>
    %246 = vector.broadcast %222 : f32 to vector<4x128xf32>
    %247 = arith.mulf %246, %15 : vector<4x128xf32>
    %248 = arith.addf %245, %247 : vector<4x128xf32>
    %249 = vector.broadcast %223 : f32 to vector<4x128xf32>
    %250 = arith.mulf %249, %16 : vector<4x128xf32>
    %251 = arith.addf %248, %250 : vector<4x128xf32>
    %252 = vector.broadcast %224 : f32 to vector<4x128xf32>
    %253 = arith.mulf %252, %17 : vector<4x128xf32>
    %254 = arith.addf %251, %253 : vector<4x128xf32>
    %255 = arith.maximumf %239, %254 : vector<4x128xf32>
    %cst_26 = arith.constant 0.000000e+00 : f32
    %256 = vector.broadcast %cst_26 : f32 to vector<4x128xf32>
    %257 = arith.maximumf %255, %256 : vector<4x128xf32>
    %c2_27 = arith.constant 2 : index
    %c0_28 = arith.constant 0 : index
    %c0_29 = arith.constant 0 : index
    %258 = vector.load %arg6[%c2_27, %c0_28, %c0_29] : memref<8x128x5xf32, #tpu.memory_space<vmem>>, vector<1x128x5xf32>
    %259 = vector.shape_cast %258 : vector<1x128x5xf32> to vector<128x5xf32>
    %cst_30 = arith.constant dense<0.000000e+00> : vector<4x5xf32>
    %260 = tpu.matmul %257, %259, %cst_30 {dimension_numbers = #tpu.dot_dimension_numbers<[1], [0], [0], [1], [0, 0, 1, 1], [], []>} : vector<4x128xf32>, vector<128x5xf32>, vector<4x5xf32> -> vector<4x5xf32>
    %261 = arith.addf %180, %260 : vector<4x5xf32>
    %c3_31 = arith.constant 3 : index
    %262 = memref.load %arg5[%c3_31] : memref<8xf32, #tpu.memory_space<smem>>
    %c3_32 = arith.constant 3 : index
    %263 = memref.load %arg5[%c3_32] : memref<8xf32, #tpu.memory_space<smem>>
    %c30 = arith.constant 30 : index
    %264 = memref.load %arg4[%c30] : memref<80xf32, #tpu.memory_space<smem>>
    %c31 = arith.constant 31 : index
    %265 = memref.load %arg4[%c31] : memref<80xf32, #tpu.memory_space<smem>>
    %c32 = arith.constant 32 : index
    %266 = memref.load %arg4[%c32] : memref<80xf32, #tpu.memory_space<smem>>
    %c33 = arith.constant 33 : index
    %267 = memref.load %arg4[%c33] : memref<80xf32, #tpu.memory_space<smem>>
    %c34 = arith.constant 34 : index
    %268 = memref.load %arg4[%c34] : memref<80xf32, #tpu.memory_space<smem>>
    %269 = vector.broadcast %264 : f32 to vector<4x128xf32>
    %270 = arith.mulf %269, %6 : vector<4x128xf32>
    %271 = vector.broadcast %262 : f32 to vector<4x128xf32>
    %272 = arith.addf %271, %270 : vector<4x128xf32>
    %273 = vector.broadcast %265 : f32 to vector<4x128xf32>
    %274 = arith.mulf %273, %7 : vector<4x128xf32>
    %275 = arith.addf %272, %274 : vector<4x128xf32>
    %276 = vector.broadcast %266 : f32 to vector<4x128xf32>
    %277 = arith.mulf %276, %8 : vector<4x128xf32>
    %278 = arith.addf %275, %277 : vector<4x128xf32>
    %279 = vector.broadcast %267 : f32 to vector<4x128xf32>
    %280 = arith.mulf %279, %9 : vector<4x128xf32>
    %281 = arith.addf %278, %280 : vector<4x128xf32>
    %282 = vector.broadcast %268 : f32 to vector<4x128xf32>
    %283 = arith.mulf %282, %10 : vector<4x128xf32>
    %284 = arith.addf %281, %283 : vector<4x128xf32>
    %285 = vector.broadcast %264 : f32 to vector<4x128xf32>
    %286 = arith.mulf %285, %7 : vector<4x128xf32>
    %287 = vector.broadcast %263 : f32 to vector<4x128xf32>
    %288 = arith.addf %287, %286 : vector<4x128xf32>
    %289 = vector.broadcast %265 : f32 to vector<4x128xf32>
    %290 = arith.mulf %289, %8 : vector<4x128xf32>
    %291 = arith.addf %288, %290 : vector<4x128xf32>
    %292 = vector.broadcast %266 : f32 to vector<4x128xf32>
    %293 = arith.mulf %292, %9 : vector<4x128xf32>
    %294 = arith.addf %291, %293 : vector<4x128xf32>
    %295 = vector.broadcast %267 : f32 to vector<4x128xf32>
    %296 = arith.mulf %295, %10 : vector<4x128xf32>
    %297 = arith.addf %294, %296 : vector<4x128xf32>
    %298 = vector.broadcast %268 : f32 to vector<4x128xf32>
    %299 = arith.mulf %298, %11 : vector<4x128xf32>
    %300 = arith.addf %297, %299 : vector<4x128xf32>
    %c35 = arith.constant 35 : index
    %301 = memref.load %arg4[%c35] : memref<80xf32, #tpu.memory_space<smem>>
    %c36 = arith.constant 36 : index
    %302 = memref.load %arg4[%c36] : memref<80xf32, #tpu.memory_space<smem>>
    %c37 = arith.constant 37 : index
    %303 = memref.load %arg4[%c37] : memref<80xf32, #tpu.memory_space<smem>>
    %c38 = arith.constant 38 : index
    %304 = memref.load %arg4[%c38] : memref<80xf32, #tpu.memory_space<smem>>
    %c39 = arith.constant 39 : index
    %305 = memref.load %arg4[%c39] : memref<80xf32, #tpu.memory_space<smem>>
    %306 = vector.broadcast %301 : f32 to vector<4x128xf32>
    %307 = arith.mulf %306, %12 : vector<4x128xf32>
    %308 = arith.addf %284, %307 : vector<4x128xf32>
    %309 = vector.broadcast %302 : f32 to vector<4x128xf32>
    %310 = arith.mulf %309, %13 : vector<4x128xf32>
    %311 = arith.addf %308, %310 : vector<4x128xf32>
    %312 = vector.broadcast %303 : f32 to vector<4x128xf32>
    %313 = arith.mulf %312, %14 : vector<4x128xf32>
    %314 = arith.addf %311, %313 : vector<4x128xf32>
    %315 = vector.broadcast %304 : f32 to vector<4x128xf32>
    %316 = arith.mulf %315, %15 : vector<4x128xf32>
    %317 = arith.addf %314, %316 : vector<4x128xf32>
    %318 = vector.broadcast %305 : f32 to vector<4x128xf32>
    %319 = arith.mulf %318, %16 : vector<4x128xf32>
    %320 = arith.addf %317, %319 : vector<4x128xf32>
    %321 = vector.broadcast %301 : f32 to vector<4x128xf32>
    %322 = arith.mulf %321, %13 : vector<4x128xf32>
    %323 = arith.addf %300, %322 : vector<4x128xf32>
    %324 = vector.broadcast %302 : f32 to vector<4x128xf32>
    %325 = arith.mulf %324, %14 : vector<4x128xf32>
    %326 = arith.addf %323, %325 : vector<4x128xf32>
    %327 = vector.broadcast %303 : f32 to vector<4x128xf32>
    %328 = arith.mulf %327, %15 : vector<4x128xf32>
    %329 = arith.addf %326, %328 : vector<4x128xf32>
    %330 = vector.broadcast %304 : f32 to vector<4x128xf32>
    %331 = arith.mulf %330, %16 : vector<4x128xf32>
    %332 = arith.addf %329, %331 : vector<4x128xf32>
    %333 = vector.broadcast %305 : f32 to vector<4x128xf32>
    %334 = arith.mulf %333, %17 : vector<4x128xf32>
    %335 = arith.addf %332, %334 : vector<4x128xf32>
    %336 = arith.maximumf %320, %335 : vector<4x128xf32>
    %cst_33 = arith.constant 0.000000e+00 : f32
    %337 = vector.broadcast %cst_33 : f32 to vector<4x128xf32>
    %338 = arith.maximumf %336, %337 : vector<4x128xf32>
    %c3_34 = arith.constant 3 : index
    %c0_35 = arith.constant 0 : index
    %c0_36 = arith.constant 0 : index
    %339 = vector.load %arg6[%c3_34, %c0_35, %c0_36] : memref<8x128x5xf32, #tpu.memory_space<vmem>>, vector<1x128x5xf32>
    %340 = vector.shape_cast %339 : vector<1x128x5xf32> to vector<128x5xf32>
    %cst_37 = arith.constant dense<0.000000e+00> : vector<4x5xf32>
    %341 = tpu.matmul %338, %340, %cst_37 {dimension_numbers = #tpu.dot_dimension_numbers<[1], [0], [0], [1], [0, 0, 1, 1], [], []>} : vector<4x128xf32>, vector<128x5xf32>, vector<4x5xf32> -> vector<4x5xf32>
    %342 = arith.addf %261, %341 : vector<4x5xf32>
    %c4_38 = arith.constant 4 : index
    %343 = memref.load %arg5[%c4_38] : memref<8xf32, #tpu.memory_space<smem>>
    %c4_39 = arith.constant 4 : index
    %344 = memref.load %arg5[%c4_39] : memref<8xf32, #tpu.memory_space<smem>>
    %c40 = arith.constant 40 : index
    %345 = memref.load %arg4[%c40] : memref<80xf32, #tpu.memory_space<smem>>
    %c41 = arith.constant 41 : index
    %346 = memref.load %arg4[%c41] : memref<80xf32, #tpu.memory_space<smem>>
    %c42 = arith.constant 42 : index
    %347 = memref.load %arg4[%c42] : memref<80xf32, #tpu.memory_space<smem>>
    %c43 = arith.constant 43 : index
    %348 = memref.load %arg4[%c43] : memref<80xf32, #tpu.memory_space<smem>>
    %c44 = arith.constant 44 : index
    %349 = memref.load %arg4[%c44] : memref<80xf32, #tpu.memory_space<smem>>
    %350 = vector.broadcast %345 : f32 to vector<4x128xf32>
    %351 = arith.mulf %350, %6 : vector<4x128xf32>
    %352 = vector.broadcast %343 : f32 to vector<4x128xf32>
    %353 = arith.addf %352, %351 : vector<4x128xf32>
    %354 = vector.broadcast %346 : f32 to vector<4x128xf32>
    %355 = arith.mulf %354, %7 : vector<4x128xf32>
    %356 = arith.addf %353, %355 : vector<4x128xf32>
    %357 = vector.broadcast %347 : f32 to vector<4x128xf32>
    %358 = arith.mulf %357, %8 : vector<4x128xf32>
    %359 = arith.addf %356, %358 : vector<4x128xf32>
    %360 = vector.broadcast %348 : f32 to vector<4x128xf32>
    %361 = arith.mulf %360, %9 : vector<4x128xf32>
    %362 = arith.addf %359, %361 : vector<4x128xf32>
    %363 = vector.broadcast %349 : f32 to vector<4x128xf32>
    %364 = arith.mulf %363, %10 : vector<4x128xf32>
    %365 = arith.addf %362, %364 : vector<4x128xf32>
    %366 = vector.broadcast %345 : f32 to vector<4x128xf32>
    %367 = arith.mulf %366, %7 : vector<4x128xf32>
    %368 = vector.broadcast %344 : f32 to vector<4x128xf32>
    %369 = arith.addf %368, %367 : vector<4x128xf32>
    %370 = vector.broadcast %346 : f32 to vector<4x128xf32>
    %371 = arith.mulf %370, %8 : vector<4x128xf32>
    %372 = arith.addf %369, %371 : vector<4x128xf32>
    %373 = vector.broadcast %347 : f32 to vector<4x128xf32>
    %374 = arith.mulf %373, %9 : vector<4x128xf32>
    %375 = arith.addf %372, %374 : vector<4x128xf32>
    %376 = vector.broadcast %348 : f32 to vector<4x128xf32>
    %377 = arith.mulf %376, %10 : vector<4x128xf32>
    %378 = arith.addf %375, %377 : vector<4x128xf32>
    %379 = vector.broadcast %349 : f32 to vector<4x128xf32>
    %380 = arith.mulf %379, %11 : vector<4x128xf32>
    %381 = arith.addf %378, %380 : vector<4x128xf32>
    %c45 = arith.constant 45 : index
    %382 = memref.load %arg4[%c45] : memref<80xf32, #tpu.memory_space<smem>>
    %c46 = arith.constant 46 : index
    %383 = memref.load %arg4[%c46] : memref<80xf32, #tpu.memory_space<smem>>
    %c47 = arith.constant 47 : index
    %384 = memref.load %arg4[%c47] : memref<80xf32, #tpu.memory_space<smem>>
    %c48 = arith.constant 48 : index
    %385 = memref.load %arg4[%c48] : memref<80xf32, #tpu.memory_space<smem>>
    %c49 = arith.constant 49 : index
    %386 = memref.load %arg4[%c49] : memref<80xf32, #tpu.memory_space<smem>>
    %387 = vector.broadcast %382 : f32 to vector<4x128xf32>
    %388 = arith.mulf %387, %12 : vector<4x128xf32>
    %389 = arith.addf %365, %388 : vector<4x128xf32>
    %390 = vector.broadcast %383 : f32 to vector<4x128xf32>
    %391 = arith.mulf %390, %13 : vector<4x128xf32>
    %392 = arith.addf %389, %391 : vector<4x128xf32>
    %393 = vector.broadcast %384 : f32 to vector<4x128xf32>
    %394 = arith.mulf %393, %14 : vector<4x128xf32>
    %395 = arith.addf %392, %394 : vector<4x128xf32>
    %396 = vector.broadcast %385 : f32 to vector<4x128xf32>
    %397 = arith.mulf %396, %15 : vector<4x128xf32>
    %398 = arith.addf %395, %397 : vector<4x128xf32>
    %399 = vector.broadcast %386 : f32 to vector<4x128xf32>
    %400 = arith.mulf %399, %16 : vector<4x128xf32>
    %401 = arith.addf %398, %400 : vector<4x128xf32>
    %402 = vector.broadcast %382 : f32 to vector<4x128xf32>
    %403 = arith.mulf %402, %13 : vector<4x128xf32>
    %404 = arith.addf %381, %403 : vector<4x128xf32>
    %405 = vector.broadcast %383 : f32 to vector<4x128xf32>
    %406 = arith.mulf %405, %14 : vector<4x128xf32>
    %407 = arith.addf %404, %406 : vector<4x128xf32>
    %408 = vector.broadcast %384 : f32 to vector<4x128xf32>
    %409 = arith.mulf %408, %15 : vector<4x128xf32>
    %410 = arith.addf %407, %409 : vector<4x128xf32>
    %411 = vector.broadcast %385 : f32 to vector<4x128xf32>
    %412 = arith.mulf %411, %16 : vector<4x128xf32>
    %413 = arith.addf %410, %412 : vector<4x128xf32>
    %414 = vector.broadcast %386 : f32 to vector<4x128xf32>
    %415 = arith.mulf %414, %17 : vector<4x128xf32>
    %416 = arith.addf %413, %415 : vector<4x128xf32>
    %417 = arith.maximumf %401, %416 : vector<4x128xf32>
    %cst_40 = arith.constant 0.000000e+00 : f32
    %418 = vector.broadcast %cst_40 : f32 to vector<4x128xf32>
    %419 = arith.maximumf %417, %418 : vector<4x128xf32>
    %c4_41 = arith.constant 4 : index
    %c0_42 = arith.constant 0 : index
    %c0_43 = arith.constant 0 : index
    %420 = vector.load %arg6[%c4_41, %c0_42, %c0_43] : memref<8x128x5xf32, #tpu.memory_space<vmem>>, vector<1x128x5xf32>
    %421 = vector.shape_cast %420 : vector<1x128x5xf32> to vector<128x5xf32>
    %cst_44 = arith.constant dense<0.000000e+00> : vector<4x5xf32>
    %422 = tpu.matmul %419, %421, %cst_44 {dimension_numbers = #tpu.dot_dimension_numbers<[1], [0], [0], [1], [0, 0, 1, 1], [], []>} : vector<4x128xf32>, vector<128x5xf32>, vector<4x5xf32> -> vector<4x5xf32>
    %423 = arith.addf %342, %422 : vector<4x5xf32>
    %c5_45 = arith.constant 5 : index
    %424 = memref.load %arg5[%c5_45] : memref<8xf32, #tpu.memory_space<smem>>
    %c5_46 = arith.constant 5 : index
    %425 = memref.load %arg5[%c5_46] : memref<8xf32, #tpu.memory_space<smem>>
    %c50 = arith.constant 50 : index
    %426 = memref.load %arg4[%c50] : memref<80xf32, #tpu.memory_space<smem>>
    %c51 = arith.constant 51 : index
    %427 = memref.load %arg4[%c51] : memref<80xf32, #tpu.memory_space<smem>>
    %c52 = arith.constant 52 : index
    %428 = memref.load %arg4[%c52] : memref<80xf32, #tpu.memory_space<smem>>
    %c53 = arith.constant 53 : index
    %429 = memref.load %arg4[%c53] : memref<80xf32, #tpu.memory_space<smem>>
    %c54 = arith.constant 54 : index
    %430 = memref.load %arg4[%c54] : memref<80xf32, #tpu.memory_space<smem>>
    %431 = vector.broadcast %426 : f32 to vector<4x128xf32>
    %432 = arith.mulf %431, %6 : vector<4x128xf32>
    %433 = vector.broadcast %424 : f32 to vector<4x128xf32>
    %434 = arith.addf %433, %432 : vector<4x128xf32>
    %435 = vector.broadcast %427 : f32 to vector<4x128xf32>
    %436 = arith.mulf %435, %7 : vector<4x128xf32>
    %437 = arith.addf %434, %436 : vector<4x128xf32>
    %438 = vector.broadcast %428 : f32 to vector<4x128xf32>
    %439 = arith.mulf %438, %8 : vector<4x128xf32>
    %440 = arith.addf %437, %439 : vector<4x128xf32>
    %441 = vector.broadcast %429 : f32 to vector<4x128xf32>
    %442 = arith.mulf %441, %9 : vector<4x128xf32>
    %443 = arith.addf %440, %442 : vector<4x128xf32>
    %444 = vector.broadcast %430 : f32 to vector<4x128xf32>
    %445 = arith.mulf %444, %10 : vector<4x128xf32>
    %446 = arith.addf %443, %445 : vector<4x128xf32>
    %447 = vector.broadcast %426 : f32 to vector<4x128xf32>
    %448 = arith.mulf %447, %7 : vector<4x128xf32>
    %449 = vector.broadcast %425 : f32 to vector<4x128xf32>
    %450 = arith.addf %449, %448 : vector<4x128xf32>
    %451 = vector.broadcast %427 : f32 to vector<4x128xf32>
    %452 = arith.mulf %451, %8 : vector<4x128xf32>
    %453 = arith.addf %450, %452 : vector<4x128xf32>
    %454 = vector.broadcast %428 : f32 to vector<4x128xf32>
    %455 = arith.mulf %454, %9 : vector<4x128xf32>
    %456 = arith.addf %453, %455 : vector<4x128xf32>
    %457 = vector.broadcast %429 : f32 to vector<4x128xf32>
    %458 = arith.mulf %457, %10 : vector<4x128xf32>
    %459 = arith.addf %456, %458 : vector<4x128xf32>
    %460 = vector.broadcast %430 : f32 to vector<4x128xf32>
    %461 = arith.mulf %460, %11 : vector<4x128xf32>
    %462 = arith.addf %459, %461 : vector<4x128xf32>
    %c55 = arith.constant 55 : index
    %463 = memref.load %arg4[%c55] : memref<80xf32, #tpu.memory_space<smem>>
    %c56 = arith.constant 56 : index
    %464 = memref.load %arg4[%c56] : memref<80xf32, #tpu.memory_space<smem>>
    %c57 = arith.constant 57 : index
    %465 = memref.load %arg4[%c57] : memref<80xf32, #tpu.memory_space<smem>>
    %c58 = arith.constant 58 : index
    %466 = memref.load %arg4[%c58] : memref<80xf32, #tpu.memory_space<smem>>
    %c59 = arith.constant 59 : index
    %467 = memref.load %arg4[%c59] : memref<80xf32, #tpu.memory_space<smem>>
    %468 = vector.broadcast %463 : f32 to vector<4x128xf32>
    %469 = arith.mulf %468, %12 : vector<4x128xf32>
    %470 = arith.addf %446, %469 : vector<4x128xf32>
    %471 = vector.broadcast %464 : f32 to vector<4x128xf32>
    %472 = arith.mulf %471, %13 : vector<4x128xf32>
    %473 = arith.addf %470, %472 : vector<4x128xf32>
    %474 = vector.broadcast %465 : f32 to vector<4x128xf32>
    %475 = arith.mulf %474, %14 : vector<4x128xf32>
    %476 = arith.addf %473, %475 : vector<4x128xf32>
    %477 = vector.broadcast %466 : f32 to vector<4x128xf32>
    %478 = arith.mulf %477, %15 : vector<4x128xf32>
    %479 = arith.addf %476, %478 : vector<4x128xf32>
    %480 = vector.broadcast %467 : f32 to vector<4x128xf32>
    %481 = arith.mulf %480, %16 : vector<4x128xf32>
    %482 = arith.addf %479, %481 : vector<4x128xf32>
    %483 = vector.broadcast %463 : f32 to vector<4x128xf32>
    %484 = arith.mulf %483, %13 : vector<4x128xf32>
    %485 = arith.addf %462, %484 : vector<4x128xf32>
    %486 = vector.broadcast %464 : f32 to vector<4x128xf32>
    %487 = arith.mulf %486, %14 : vector<4x128xf32>
    %488 = arith.addf %485, %487 : vector<4x128xf32>
    %489 = vector.broadcast %465 : f32 to vector<4x128xf32>
    %490 = arith.mulf %489, %15 : vector<4x128xf32>
    %491 = arith.addf %488, %490 : vector<4x128xf32>
    %492 = vector.broadcast %466 : f32 to vector<4x128xf32>
    %493 = arith.mulf %492, %16 : vector<4x128xf32>
    %494 = arith.addf %491, %493 : vector<4x128xf32>
    %495 = vector.broadcast %467 : f32 to vector<4x128xf32>
    %496 = arith.mulf %495, %17 : vector<4x128xf32>
    %497 = arith.addf %494, %496 : vector<4x128xf32>
    %498 = arith.maximumf %482, %497 : vector<4x128xf32>
    %cst_47 = arith.constant 0.000000e+00 : f32
    %499 = vector.broadcast %cst_47 : f32 to vector<4x128xf32>
    %500 = arith.maximumf %498, %499 : vector<4x128xf32>
    %c5_48 = arith.constant 5 : index
    %c0_49 = arith.constant 0 : index
    %c0_50 = arith.constant 0 : index
    %501 = vector.load %arg6[%c5_48, %c0_49, %c0_50] : memref<8x128x5xf32, #tpu.memory_space<vmem>>, vector<1x128x5xf32>
    %502 = vector.shape_cast %501 : vector<1x128x5xf32> to vector<128x5xf32>
    %cst_51 = arith.constant dense<0.000000e+00> : vector<4x5xf32>
    %503 = tpu.matmul %500, %502, %cst_51 {dimension_numbers = #tpu.dot_dimension_numbers<[1], [0], [0], [1], [0, 0, 1, 1], [], []>} : vector<4x128xf32>, vector<128x5xf32>, vector<4x5xf32> -> vector<4x5xf32>
    %504 = arith.addf %423, %503 : vector<4x5xf32>
    %c6_52 = arith.constant 6 : index
    %505 = memref.load %arg5[%c6_52] : memref<8xf32, #tpu.memory_space<smem>>
    %c6_53 = arith.constant 6 : index
    %506 = memref.load %arg5[%c6_53] : memref<8xf32, #tpu.memory_space<smem>>
    %c60 = arith.constant 60 : index
    %507 = memref.load %arg4[%c60] : memref<80xf32, #tpu.memory_space<smem>>
    %c61 = arith.constant 61 : index
    %508 = memref.load %arg4[%c61] : memref<80xf32, #tpu.memory_space<smem>>
    %c62 = arith.constant 62 : index
    %509 = memref.load %arg4[%c62] : memref<80xf32, #tpu.memory_space<smem>>
    %c63 = arith.constant 63 : index
    %510 = memref.load %arg4[%c63] : memref<80xf32, #tpu.memory_space<smem>>
    %c64 = arith.constant 64 : index
    %511 = memref.load %arg4[%c64] : memref<80xf32, #tpu.memory_space<smem>>
    %512 = vector.broadcast %507 : f32 to vector<4x128xf32>
    %513 = arith.mulf %512, %6 : vector<4x128xf32>
    %514 = vector.broadcast %505 : f32 to vector<4x128xf32>
    %515 = arith.addf %514, %513 : vector<4x128xf32>
    %516 = vector.broadcast %508 : f32 to vector<4x128xf32>
    %517 = arith.mulf %516, %7 : vector<4x128xf32>
    %518 = arith.addf %515, %517 : vector<4x128xf32>
    %519 = vector.broadcast %509 : f32 to vector<4x128xf32>
    %520 = arith.mulf %519, %8 : vector<4x128xf32>
    %521 = arith.addf %518, %520 : vector<4x128xf32>
    %522 = vector.broadcast %510 : f32 to vector<4x128xf32>
    %523 = arith.mulf %522, %9 : vector<4x128xf32>
    %524 = arith.addf %521, %523 : vector<4x128xf32>
    %525 = vector.broadcast %511 : f32 to vector<4x128xf32>
    %526 = arith.mulf %525, %10 : vector<4x128xf32>
    %527 = arith.addf %524, %526 : vector<4x128xf32>
    %528 = vector.broadcast %507 : f32 to vector<4x128xf32>
    %529 = arith.mulf %528, %7 : vector<4x128xf32>
    %530 = vector.broadcast %506 : f32 to vector<4x128xf32>
    %531 = arith.addf %530, %529 : vector<4x128xf32>
    %532 = vector.broadcast %508 : f32 to vector<4x128xf32>
    %533 = arith.mulf %532, %8 : vector<4x128xf32>
    %534 = arith.addf %531, %533 : vector<4x128xf32>
    %535 = vector.broadcast %509 : f32 to vector<4x128xf32>
    %536 = arith.mulf %535, %9 : vector<4x128xf32>
    %537 = arith.addf %534, %536 : vector<4x128xf32>
    %538 = vector.broadcast %510 : f32 to vector<4x128xf32>
    %539 = arith.mulf %538, %10 : vector<4x128xf32>
    %540 = arith.addf %537, %539 : vector<4x128xf32>
    %541 = vector.broadcast %511 : f32 to vector<4x128xf32>
    %542 = arith.mulf %541, %11 : vector<4x128xf32>
    %543 = arith.addf %540, %542 : vector<4x128xf32>
    %c65 = arith.constant 65 : index
    %544 = memref.load %arg4[%c65] : memref<80xf32, #tpu.memory_space<smem>>
    %c66 = arith.constant 66 : index
    %545 = memref.load %arg4[%c66] : memref<80xf32, #tpu.memory_space<smem>>
    %c67 = arith.constant 67 : index
    %546 = memref.load %arg4[%c67] : memref<80xf32, #tpu.memory_space<smem>>
    %c68 = arith.constant 68 : index
    %547 = memref.load %arg4[%c68] : memref<80xf32, #tpu.memory_space<smem>>
    %c69 = arith.constant 69 : index
    %548 = memref.load %arg4[%c69] : memref<80xf32, #tpu.memory_space<smem>>
    %549 = vector.broadcast %544 : f32 to vector<4x128xf32>
    %550 = arith.mulf %549, %12 : vector<4x128xf32>
    %551 = arith.addf %527, %550 : vector<4x128xf32>
    %552 = vector.broadcast %545 : f32 to vector<4x128xf32>
    %553 = arith.mulf %552, %13 : vector<4x128xf32>
    %554 = arith.addf %551, %553 : vector<4x128xf32>
    %555 = vector.broadcast %546 : f32 to vector<4x128xf32>
    %556 = arith.mulf %555, %14 : vector<4x128xf32>
    %557 = arith.addf %554, %556 : vector<4x128xf32>
    %558 = vector.broadcast %547 : f32 to vector<4x128xf32>
    %559 = arith.mulf %558, %15 : vector<4x128xf32>
    %560 = arith.addf %557, %559 : vector<4x128xf32>
    %561 = vector.broadcast %548 : f32 to vector<4x128xf32>
    %562 = arith.mulf %561, %16 : vector<4x128xf32>
    %563 = arith.addf %560, %562 : vector<4x128xf32>
    %564 = vector.broadcast %544 : f32 to vector<4x128xf32>
    %565 = arith.mulf %564, %13 : vector<4x128xf32>
    %566 = arith.addf %543, %565 : vector<4x128xf32>
    %567 = vector.broadcast %545 : f32 to vector<4x128xf32>
    %568 = arith.mulf %567, %14 : vector<4x128xf32>
    %569 = arith.addf %566, %568 : vector<4x128xf32>
    %570 = vector.broadcast %546 : f32 to vector<4x128xf32>
    %571 = arith.mulf %570, %15 : vector<4x128xf32>
    %572 = arith.addf %569, %571 : vector<4x128xf32>
    %573 = vector.broadcast %547 : f32 to vector<4x128xf32>
    %574 = arith.mulf %573, %16 : vector<4x128xf32>
    %575 = arith.addf %572, %574 : vector<4x128xf32>
    %576 = vector.broadcast %548 : f32 to vector<4x128xf32>
    %577 = arith.mulf %576, %17 : vector<4x128xf32>
    %578 = arith.addf %575, %577 : vector<4x128xf32>
    %579 = arith.maximumf %563, %578 : vector<4x128xf32>
    %cst_54 = arith.constant 0.000000e+00 : f32
    %580 = vector.broadcast %cst_54 : f32 to vector<4x128xf32>
    %581 = arith.maximumf %579, %580 : vector<4x128xf32>
    %c6_55 = arith.constant 6 : index
    %c0_56 = arith.constant 0 : index
    %c0_57 = arith.constant 0 : index
    %582 = vector.load %arg6[%c6_55, %c0_56, %c0_57] : memref<8x128x5xf32, #tpu.memory_space<vmem>>, vector<1x128x5xf32>
    %583 = vector.shape_cast %582 : vector<1x128x5xf32> to vector<128x5xf32>
    %cst_58 = arith.constant dense<0.000000e+00> : vector<4x5xf32>
    %584 = tpu.matmul %581, %583, %cst_58 {dimension_numbers = #tpu.dot_dimension_numbers<[1], [0], [0], [1], [0, 0, 1, 1], [], []>} : vector<4x128xf32>, vector<128x5xf32>, vector<4x5xf32> -> vector<4x5xf32>
    %585 = arith.addf %504, %584 : vector<4x5xf32>
    %c7_59 = arith.constant 7 : index
    %586 = memref.load %arg5[%c7_59] : memref<8xf32, #tpu.memory_space<smem>>
    %c7_60 = arith.constant 7 : index
    %587 = memref.load %arg5[%c7_60] : memref<8xf32, #tpu.memory_space<smem>>
    %c70 = arith.constant 70 : index
    %588 = memref.load %arg4[%c70] : memref<80xf32, #tpu.memory_space<smem>>
    %c71 = arith.constant 71 : index
    %589 = memref.load %arg4[%c71] : memref<80xf32, #tpu.memory_space<smem>>
    %c72 = arith.constant 72 : index
    %590 = memref.load %arg4[%c72] : memref<80xf32, #tpu.memory_space<smem>>
    %c73 = arith.constant 73 : index
    %591 = memref.load %arg4[%c73] : memref<80xf32, #tpu.memory_space<smem>>
    %c74 = arith.constant 74 : index
    %592 = memref.load %arg4[%c74] : memref<80xf32, #tpu.memory_space<smem>>
    %593 = vector.broadcast %588 : f32 to vector<4x128xf32>
    %594 = arith.mulf %593, %6 : vector<4x128xf32>
    %595 = vector.broadcast %586 : f32 to vector<4x128xf32>
    %596 = arith.addf %595, %594 : vector<4x128xf32>
    %597 = vector.broadcast %589 : f32 to vector<4x128xf32>
    %598 = arith.mulf %597, %7 : vector<4x128xf32>
    %599 = arith.addf %596, %598 : vector<4x128xf32>
    %600 = vector.broadcast %590 : f32 to vector<4x128xf32>
    %601 = arith.mulf %600, %8 : vector<4x128xf32>
    %602 = arith.addf %599, %601 : vector<4x128xf32>
    %603 = vector.broadcast %591 : f32 to vector<4x128xf32>
    %604 = arith.mulf %603, %9 : vector<4x128xf32>
    %605 = arith.addf %602, %604 : vector<4x128xf32>
    %606 = vector.broadcast %592 : f32 to vector<4x128xf32>
    %607 = arith.mulf %606, %10 : vector<4x128xf32>
    %608 = arith.addf %605, %607 : vector<4x128xf32>
    %609 = vector.broadcast %588 : f32 to vector<4x128xf32>
    %610 = arith.mulf %609, %7 : vector<4x128xf32>
    %611 = vector.broadcast %587 : f32 to vector<4x128xf32>
    %612 = arith.addf %611, %610 : vector<4x128xf32>
    %613 = vector.broadcast %589 : f32 to vector<4x128xf32>
    %614 = arith.mulf %613, %8 : vector<4x128xf32>
    %615 = arith.addf %612, %614 : vector<4x128xf32>
    %616 = vector.broadcast %590 : f32 to vector<4x128xf32>
    %617 = arith.mulf %616, %9 : vector<4x128xf32>
    %618 = arith.addf %615, %617 : vector<4x128xf32>
    %619 = vector.broadcast %591 : f32 to vector<4x128xf32>
    %620 = arith.mulf %619, %10 : vector<4x128xf32>
    %621 = arith.addf %618, %620 : vector<4x128xf32>
    %622 = vector.broadcast %592 : f32 to vector<4x128xf32>
    %623 = arith.mulf %622, %11 : vector<4x128xf32>
    %624 = arith.addf %621, %623 : vector<4x128xf32>
    %c75 = arith.constant 75 : index
    %625 = memref.load %arg4[%c75] : memref<80xf32, #tpu.memory_space<smem>>
    %c76 = arith.constant 76 : index
    %626 = memref.load %arg4[%c76] : memref<80xf32, #tpu.memory_space<smem>>
    %c77 = arith.constant 77 : index
    %627 = memref.load %arg4[%c77] : memref<80xf32, #tpu.memory_space<smem>>
    %c78 = arith.constant 78 : index
    %628 = memref.load %arg4[%c78] : memref<80xf32, #tpu.memory_space<smem>>
    %c79 = arith.constant 79 : index
    %629 = memref.load %arg4[%c79] : memref<80xf32, #tpu.memory_space<smem>>
    %630 = vector.broadcast %625 : f32 to vector<4x128xf32>
    %631 = arith.mulf %630, %12 : vector<4x128xf32>
    %632 = arith.addf %608, %631 : vector<4x128xf32>
    %633 = vector.broadcast %626 : f32 to vector<4x128xf32>
    %634 = arith.mulf %633, %13 : vector<4x128xf32>
    %635 = arith.addf %632, %634 : vector<4x128xf32>
    %636 = vector.broadcast %627 : f32 to vector<4x128xf32>
    %637 = arith.mulf %636, %14 : vector<4x128xf32>
    %638 = arith.addf %635, %637 : vector<4x128xf32>
    %639 = vector.broadcast %628 : f32 to vector<4x128xf32>
    %640 = arith.mulf %639, %15 : vector<4x128xf32>
    %641 = arith.addf %638, %640 : vector<4x128xf32>
    %642 = vector.broadcast %629 : f32 to vector<4x128xf32>
    %643 = arith.mulf %642, %16 : vector<4x128xf32>
    %644 = arith.addf %641, %643 : vector<4x128xf32>
    %645 = vector.broadcast %625 : f32 to vector<4x128xf32>
    %646 = arith.mulf %645, %13 : vector<4x128xf32>
    %647 = arith.addf %624, %646 : vector<4x128xf32>
    %648 = vector.broadcast %626 : f32 to vector<4x128xf32>
    %649 = arith.mulf %648, %14 : vector<4x128xf32>
    %650 = arith.addf %647, %649 : vector<4x128xf32>
    %651 = vector.broadcast %627 : f32 to vector<4x128xf32>
    %652 = arith.mulf %651, %15 : vector<4x128xf32>
    %653 = arith.addf %650, %652 : vector<4x128xf32>
    %654 = vector.broadcast %628 : f32 to vector<4x128xf32>
    %655 = arith.mulf %654, %16 : vector<4x128xf32>
    %656 = arith.addf %653, %655 : vector<4x128xf32>
    %657 = vector.broadcast %629 : f32 to vector<4x128xf32>
    %658 = arith.mulf %657, %17 : vector<4x128xf32>
    %659 = arith.addf %656, %658 : vector<4x128xf32>
    %660 = arith.maximumf %644, %659 : vector<4x128xf32>
    %cst_61 = arith.constant 0.000000e+00 : f32
    %661 = vector.broadcast %cst_61 : f32 to vector<4x128xf32>
    %662 = arith.maximumf %660, %661 : vector<4x128xf32>
    %c7_62 = arith.constant 7 : index
    %c0_63 = arith.constant 0 : index
    %c0_64 = arith.constant 0 : index
    %663 = vector.load %arg6[%c7_62, %c0_63, %c0_64] : memref<8x128x5xf32, #tpu.memory_space<vmem>>, vector<1x128x5xf32>
    %664 = vector.shape_cast %663 : vector<1x128x5xf32> to vector<128x5xf32>
    %cst_65 = arith.constant dense<0.000000e+00> : vector<4x5xf32>
    %665 = tpu.matmul %662, %664, %cst_65 {dimension_numbers = #tpu.dot_dimension_numbers<[1], [0], [0], [1], [0, 0, 1, 1], [], []>} : vector<4x128xf32>, vector<128x5xf32>, vector<4x5xf32> -> vector<4x5xf32>
    %666 = arith.addf %585, %665 : vector<4x5xf32>
    %c0_66 = arith.constant 0 : index
    %c0_67 = arith.constant 0 : index
    %667 = vector.load %arg7[%c0_66, %c0_67] : memref<1x5xf32, #tpu.memory_space<vmem>>, vector<1x5xf32>
    %668 = vector.broadcast %667 : vector<1x5xf32> to vector<4x5xf32>
    %669 = arith.addf %666, %668 : vector<4x5xf32>
    %cst_68 = arith.constant dense<0xFF800000> : vector<4xf32>
    %670 = vector.multi_reduction <maximumf>, %669, %cst_68 [1] : vector<4x5xf32> to vector<4xf32>
    %671 = vector.shape_cast %670 : vector<4xf32> to vector<4x1xf32>
    %672 = vector.broadcast %671 : vector<4x1xf32> to vector<4x5xf32>
    %673 = arith.subf %669, %672 : vector<4x5xf32>
    %674 = math.exp %673 : vector<4x5xf32>
    %cst_69 = arith.constant dense<0.000000e+00> : vector<4xf32>
    %675 = vector.multi_reduction <add>, %674, %cst_69 [1] : vector<4x5xf32> to vector<4xf32>
    %676 = vector.shape_cast %675 : vector<4xf32> to vector<4x1xf32>
    %677 = vector.broadcast %676 : vector<4x1xf32> to vector<4x5xf32>
    %678 = arith.divf %674, %677 : vector<4x5xf32>
    %c0_70 = arith.constant 0 : index
    %c0_71 = arith.constant 0 : index
    %679 = vector.load %arg9[%c0_70, %c0_71] : memref<4x5xf32, #tpu.memory_space<vmem>>, vector<4x5xf32>
    tpu.vector_store %arg9[%c0_70, %c0_71], %678 {strides = array<i32>} : memref<4x5xf32, #tpu.memory_space<vmem>>, vector<4x5xf32>,
    %cst_72 = arith.constant dense<0xFF800000> : vector<4xf32>
    %680 = vector.multi_reduction <maximumf>, %678, %cst_72 [1] : vector<4x5xf32> to vector<4xf32>
    %681 = vector.shape_cast %680 : vector<4xf32> to vector<4x1xf32>
    %682 = vector.broadcast %681 : vector<4x1xf32> to vector<4x5xf32>
    %683 = arith.subf %678, %682 : vector<4x5xf32>
    %684 = math.exp %683 : vector<4x5xf32>
    %cst_73 = arith.constant dense<0.000000e+00> : vector<4xf32>
    %685 = vector.multi_reduction <add>, %684, %cst_73 [1] : vector<4x5xf32> to vector<4xf32>
    %686 = vector.shape_cast %685 : vector<4xf32> to vector<4x1xf32>
    %687 = math.log %686 : vector<4x1xf32>
    %688 = arith.addf %681, %687 : vector<4x1xf32>
    %689 = vector.broadcast %688 : vector<4x1xf32> to vector<4x5xf32>
    %690 = arith.subf %678, %689 : vector<4x5xf32>
    %c0_74 = arith.constant 0 : index
    %c0_75 = arith.constant 0 : index
    %691 = vector.load %arg8[%c0_74, %c0_75] : memref<4x5xf32, #tpu.memory_space<vmem>>, vector<4x5xf32>
    %692 = arith.mulf %691, %690 : vector<4x5xf32>
    %cst_76 = arith.constant dense<0.000000e+00> : vector<4xf32>
    %693 = vector.multi_reduction <add>, %692, %cst_76 [1] : vector<4x5xf32> to vector<4xf32>
    %694 = vector.shape_cast %693 : vector<4xf32> to vector<4x1xf32>
    %cst_77 = arith.constant 0.000000e+00 : f32
    %695 = vector.broadcast %cst_77 : f32 to vector<4x1xf32>
    %696 = arith.subf %695, %694 : vector<4x1xf32>
    %cst_78 = arith.constant dense<0.000000e+00> : vector<1xf32>
    %697 = vector.multi_reduction <add>, %696, %cst_78 [0] : vector<4x1xf32> to vector<1xf32>
    %698 = vector.shape_cast %697 : vector<1xf32> to vector<1x1xf32>
    %cst_79 = arith.constant 2.500000e-01 : f32
    %699 = vector.broadcast %cst_79 : f32 to vector<1x1xf32>
    %700 = arith.mulf %698, %699 : vector<1x1xf32>
    %c0_80 = arith.constant 0 : index
    %c0_81 = arith.constant 0 : index
    %701 = vector.load %arg10[%c0_80, %c0_81] : memref<1x1xf32, #tpu.memory_space<vmem>>, vector<1x1xf32>
    tpu.vector_store %arg10[%c0_80, %c0_81], %700 {strides = array<i32>} : memref<1x1xf32, #tpu.memory_space<vmem>>, vector<1x1xf32>,
    return
  }
}

</mosaic_0001>

<bundles_post_ra>
// kernel: brainclip_classifier_forward.1
= control target key start
LH: loop header
LB: loop body
LE: loop exit
PB: predicated region body
PF: predicated region fallthrough
CT: control target
= control target key end

     0   :  { %s3322_s0 = inlined_call_operand.vmem [shape: f32[4,128], index: 0, kind: input, shape index: {}]   ;;  %s3323_s1 = inlined_call_operand.vmem [shape: f32[4,64], index: 1, kind: input, shape index: {}]   ;;  %s3324_s2 = inlined_call_operand.vmem [shape: f32[128,768], index: 2, kind: input, shape index: {}]   ;;  %s3325_s3 = inlined_call_operand.vmem [shape: f32[64,768], index: 3, kind: input, shape index: {}]   ;;  %s3326_s4 = inlined_call_operand.vmem [shape: f32[80], index: 4, kind: input, shape index: {}]   ;;  %s3327_s5 = inlined_call_operand.vmem [shape: f32[8], index: 5, kind: input, shape index: {}]   ;;  %s3328_s6 = inlined_call_operand.vmem [shape: f32[8,128,5], index: 6, kind: input, shape index: {}]   ;;  %s3329_s7 = inlined_call_operand.vmem [shape: f32[1,5], index: 7, kind: input, shape index: {}]   ;;  %s3330_s8 = inlined_call_operand.vmem [shape: f32[4,5], index: 8, kind: input, shape index: {}]   ;;  %s3331_s9 = inlined_call_operand.hbm [shape: f32[4,5], index: 9, kind: output, shape index: {0}]   ;;  %s3332_s10 = inlined_call_operand.hbm [shape: f32[1,1], index: 10, kind: output, shape index: {1}]  }
   0x1   :  { %3418 = sst [smem:[#allocation52_spill]] %s3329_s7 }
   0x2   :  { %3419 = sst [smem:[#allocation53_spill]] %s3330_s8 }
   0x3   :  { %3420 = sst [smem:[#allocation54_spill]] %s3331_s9 }
   0x4   :  { %3421 = sst [smem:[#allocation55_spill]] %s3332_s10 }
   0x5   :  { %16 = vsyncpa [#allocation4], 0 }
   0x6   :  { %17 = vsyncpa [#allocation6], 0 }
   0x7   :  { %18 = vsyncpa [#allocation3], 0 }
   0x8   :  { %19 = vsyncpa [#allocation9], 0  ;;  %s33_s15 = sshll.u32 %s3326_s4, 4  ;;  %s42_s18 = sshll.u32 %s3327_s5, 4  ;;  %s34_s15 = int_to_ptr.vmem [resolvable:$true] %s33_s15  ;;  %s43_s18 = int_to_ptr.vmem [resolvable:$true] %s42_s18 }
   0x9   :  { %s1656_s19 = smov [#allocation2]   ;;  %s1657_s20 = smov [#allocation5]  }
   0xa   :  { %36 = dma.vmem_to_smem %s34_s15, 16, %s1656_s19, [#allocation4]  }
   0xb   :  { %45 = dma.vmem_to_smem %s43_s18, 16, %s1657_s20, [#allocation6]  }
   0xc   :  { %1648 = dma.done.wait [#allocation4], 16  }
   0xd   :  { %1649 = vsyncadd [#allocation4], 4294967280 }
   0xe   :  { %1650 = dma.done.wait [#allocation6], 16  }
   0xf   :  { %1651 = vsyncadd [#allocation6], 4294967280 }
  0x10   :  { %60 = sfence }
  0x11   :  { %v152_v0 = vld [vmem:[%s3324_s2 + $0x2d0] sm:$0xff]  ;;  %v154_v1 = vld [vmem:[%s3324_s2 + $0x2e0] sm:$0xff]  ;;  %v153_v3 = vld [vmem:[%s3324_s2 + $0x2d8] sm:$0xff]  ;;  %vm327_vm0 = vcmask 523264   ;;  %s2289_s14 = sld [smem:[#allocation2]]  ;;  %vm1269_vm1 = vcmask 35840  }
  0x12   :  { %v146_v2 = vld [vmem:[%s3324_s2 + $0x2a0] sm:$0xff]  ;;  %158 = vmatpush.msra.mxu0 %v152_v0  ;;  %198 = vmatpush.msra.mxu2 %v154_v1  ;;  %v148_v4 = vld [vmem:[%s3324_s2 + $0x2b0] sm:$0xff]  ;;  %v155_v5 = vld [vmem:[%s3324_s2 + $0x2e8] sm:$0xff]  ;;  %s2291_s15 = sld [smem:[#allocation5]]  ;;  %vm1314_vm6 = vcmask 1043456   ;;  %vm1323_vm7 = vcmask 0  }
  0x13   :  { %178 = vmatpush.msra.mxu1 %v153_v3  ;;  %218 = vmatpush.msra.mxu3 %v155_v5  ;;  %v140_v6 = vld [vmem:[%s3324_s2 + $0x270] sm:$0xff]  ;;  %v147_v7 = vld [vmem:[%s3324_s2 + $0x2a8] sm:$0xff]  ;;  %v142_v8 = vld [vmem:[%s3324_s2 + $0x280] sm:$0xff]  ;;  %s2293_s16 = sld [smem:[#allocation5 + $0x1]] }
  0x14   :  { %159 = vmatpush.msra.mxu0 %v146_v2  ;;  %199 = vmatpush.msra.mxu2 %v148_v4  ;;  %v149_v9 = vld [vmem:[%s3324_s2 + $0x2b8] sm:$0xff]  ;;  %v134_v11 = vld [vmem:[%s3324_s2 + $0x240] sm:$0xff]  ;;  %v136_v12 = vld [vmem:[%s3324_s2 + $0x250] sm:$0xff]  ;;  %s2299_s17 = sld [smem:[#allocation2 + $0x14]] }
  0x15   :  { %v141_v10 = vld [vmem:[%s3324_s2 + $0x278] sm:$0xff]  ;;  %179 = vmatpush.msra.mxu1 %v147_v7  ;;  %219 = vmatpush.msra.mxu3 %v149_v9  ;;  %v143_v13 = vld [vmem:[%s3324_s2 + $0x288] sm:$0xff]  ;;  %v128_v16 = vld [vmem:[%s3324_s2 + $0x210] sm:$0xff]  ;;  %s2301_s18 = sld [smem:[#allocation5 + $0x3]] }
  0x16   :  { %160 = vmatpush.msra.mxu0 %v140_v6  ;;  %200 = vmatpush.msra.mxu2 %v142_v8  ;;  %v135_v14 = vld [vmem:[%s3324_s2 + $0x248] sm:$0xff]  ;;  %v137_v15 = vld [vmem:[%s3324_s2 + $0x258] sm:$0xff]  ;;  %v130_v17 = vld [vmem:[%s3324_s2 + $0x220] sm:$0xff]  ;;  %s2303_s19 = sld [smem:[#allocation2 + $0x1e]] }
  0x17   :  { %180 = vmatpush.msra.mxu1 %v141_v10  ;;  %220 = vmatpush.msra.mxu3 %v143_v13  ;;  %v129_v18 = vld [vmem:[%s3324_s2 + $0x218] sm:$0xff]  ;;  %v131_v19 = vld [vmem:[%s3324_s2 + $0x228] sm:$0xff]  ;;  %v122_v20 = vld [vmem:[%s3324_s2 + $0x1e0] sm:$0xff]  ;;  %3422 = sst [smem:[#allocation14_spill]] %s2289_s14 }
  0x18   :  { %161 = vmatpush.msra.mxu0 %v134_v11  ;;  %201 = vmatpush.msra.mxu2 %v136_v12  ;;  %v124_v21 = vld [vmem:[%s3324_s2 + $0x1f0] sm:$0xff]  ;;  %v123_v22 = vld [vmem:[%s3324_s2 + $0x1e8] sm:$0xff]  ;;  %v125_v23 = vld [vmem:[%s3324_s2 + $0x1f8] sm:$0xff]  ;;  %3423 = sst [smem:[#allocation15_spill]] %s2291_s15 }
  0x19   :  { %181 = vmatpush.msra.mxu1 %v135_v14  ;;  %221 = vmatpush.msra.mxu3 %v137_v15  ;;  %v116_v24 = vld [vmem:[%s3324_s2 + $0x1b0] sm:$0xff]  ;;  %v118_v25 = vld [vmem:[%s3324_s2 + $0x1c0] sm:$0xff]  ;;  %v117_v26 = vld [vmem:[%s3324_s2 + $0x1b8] sm:$0xff]  ;;  %3424 = sst [smem:[#allocation16_spill]] %s2293_s16 }
  0x1a   :  { %162 = vmatpush.msra.mxu0 %v128_v16  ;;  %202 = vmatpush.msra.mxu2 %v130_v17  ;;  %v119_v27 = vld [vmem:[%s3324_s2 + $0x1c8] sm:$0xff]  ;;  %v110_v28 = vld [vmem:[%s3324_s2 + $0x180] sm:$0xff]  ;;  %v112_v29 = vld [vmem:[%s3324_s2 + $0x190] sm:$0xff]  ;;  %3426 = sst [smem:[#allocation18_spill]] %s2299_s17 }
  0x1b   :  { %182 = vmatpush.msra.mxu1 %v129_v18  ;;  %222 = vmatpush.msra.mxu3 %v131_v19  ;;  %v111_v30 = vld [vmem:[%s3324_s2 + $0x188] sm:$0xff]  ;;  %v113_v31 = vld [vmem:[%s3324_s2 + $0x198] sm:$0xff]  ;;  %v104_v32 = vld [vmem:[%s3324_s2 + $0x150] sm:$0xff]  ;;  %3427 = sst [smem:[#allocation19_spill]] %s2301_s18 }
  0x1c   :  { %163 = vmatpush.msra.mxu0 %v122_v20  ;;  %203 = vmatpush.msra.mxu2 %v124_v21  ;;  %v106_v33 = vld [vmem:[%s3324_s2 + $0x160] sm:$0xff]  ;;  %v105_v34 = vld [vmem:[%s3324_s2 + $0x158] sm:$0xff]  ;;  %v107_v35 = vld [vmem:[%s3324_s2 + $0x168] sm:$0xff]  ;;  %3428 = sst [smem:[#allocation20_spill]] %s2303_s19 }
  0x1d   :  { %183 = vmatpush.msra.mxu1 %v123_v22  ;;  %223 = vmatpush.msra.mxu3 %v125_v23  ;;  %v98_v36 = vld [vmem:[%s3324_s2 + $0x120] sm:$0xff]  ;;  %v100_v37 = vld [vmem:[%s3324_s2 + $0x130] sm:$0xff]  ;;  %v99_v38 = vld [vmem:[%s3324_s2 + $0x128] sm:$0xff]  ;;  %s2305_s20 = sld [smem:[#allocation5 + $0x4]] }
  0x1e   :  { %164 = vmatpush.msra.mxu0 %v116_v24  ;;  %204 = vmatpush.msra.mxu2 %v118_v25  ;;  %v101_v39 = vld [vmem:[%s3324_s2 + $0x138] sm:$0xff]  ;;  %v92_v40 = vld [vmem:[%s3324_s2 + $0xf0] sm:$0xff]  ;;  %v94_v41 = vld [vmem:[%s3324_s2 + $0x100] sm:$0xff]  ;;  %s2307_s21 = sld [smem:[#allocation2 + $0x28]] }
  0x1f   :  { %184 = vmatpush.msra.mxu1 %v117_v26  ;;  %224 = vmatpush.msra.mxu3 %v119_v27  ;;  %v93_v42 = vld [vmem:[%s3324_s2 + $0xf8] sm:$0xff]  ;;  %v95_v43 = vld [vmem:[%s3324_s2 + $0x108] sm:$0xff]  ;;  %v86_v44 = vld [vmem:[%s3324_s2 + $0xc0] sm:$0xff]  ;;  %s2309_s22 = sld [smem:[#allocation5 + $0x5]] }
  0x20   :  { %165 = vmatpush.msra.mxu0 %v110_v28  ;;  %205 = vmatpush.msra.mxu2 %v112_v29  ;;  %v88_v45 = vld [vmem:[%s3324_s2 + $0xd0] sm:$0xff]  ;;  %v87_v46 = vld [vmem:[%s3324_s2 + $0xc8] sm:$0xff]  ;;  %v89_v47 = vld [vmem:[%s3324_s2 + $0xd8] sm:$0xff]  ;;  %s2311_s4 = sld [smem:[#allocation2 + $0x32]] }
  0x21   :  { %185 = vmatpush.msra.mxu1 %v111_v30  ;;  %225 = vmatpush.msra.mxu3 %v113_v31  ;;  %v80_v48 = vld [vmem:[%s3324_s2 + $0x90] sm:$0xff]  ;;  %v82_v49 = vld [vmem:[%s3324_s2 + $0xa0] sm:$0xff]  ;;  %v81_v50 = vld [vmem:[%s3324_s2 + $0x98] sm:$0xff]  ;;  %s2313_s23 = sld [smem:[#allocation5 + $0x6]] }
  0x22   :  { %166 = vmatpush.msra.mxu0 %v104_v32  ;;  %206 = vmatpush.msra.mxu2 %v106_v33  ;;  %v83_v51 = vld [vmem:[%s3324_s2 + $0xa8] sm:$0xff]  ;;  %v74_v52 = vld [vmem:[%s3324_s2 + $0x60] sm:$0xff]  ;;  %v76_v53 = vld [vmem:[%s3324_s2 + $0x70] sm:$0xff]  ;;  %s2315_s24 = sld [smem:[#allocation2 + $0x3c]] }
  0x23   :  { %186 = vmatpush.msra.mxu1 %v105_v34  ;;  %226 = vmatpush.msra.mxu3 %v107_v35  ;;  %v75_v54 = vld [vmem:[%s3324_s2 + $0x68] sm:$0xff]  ;;  %v77_v55 = vld [vmem:[%s3324_s2 + $0x78] sm:$0xff]  ;;  %v68_v56 = vld [vmem:[%s3324_s2 + $0x30] sm:$0xff]  ;;  %3429 = sst [smem:[#allocation21_spill]] %s2305_s20 }
  0x24   :  { %167 = vmatpush.msra.mxu0 %v98_v36  ;;  %207 = vmatpush.msra.mxu2 %v100_v37  ;;  %v70_v57 = vld [vmem:[%s3324_s2 + $0x40] sm:$0xff]  ;;  %v69_v58 = vld [vmem:[%s3324_s2 + $0x38] sm:$0xff]  ;;  %v71_v59 = vld [vmem:[%s3324_s2 + $0x48] sm:$0xff]  ;;  %3430 = sst [smem:[#allocation22_spill]] %s2307_s21 }
  0x25   :  { %187 = vmatpush.msra.mxu1 %v99_v38  ;;  %227 = vmatpush.msra.mxu3 %v101_v39  ;;  %v62_v60 = vld [vmem:[%s3324_s2] sm:$0xff]  ;;  %v64_v61 = vld [vmem:[%s3324_s2 + $0x10] sm:$0xff]  ;;  %v63_v63 = vld [vmem:[%s3324_s2 + $0x8] sm:$0xff]  ;;  %3431 = sst [smem:[#allocation23_spill]] %s2309_s22 }
  0x26   :  { %168 = vmatpush.msra.mxu0 %v92_v40  ;;  %208 = vmatpush.msra.mxu2 %v94_v41  ;;  %v156_v62 = vld [vmem:[%s3324_s2 + $0x2f0] sm:$0xff]  ;;  %v65_v1 = vld [vmem:[%s3324_s2 + $0x18] sm:$0xff]  ;;  %v150_v2 = vld [vmem:[%s3324_s2 + $0x2c0] sm:$0xff]  ;;  %3432 = sst [smem:[#allocation24_spill]] %s2311_s4 }
  0x27   :  { %188 = vmatpush.msra.mxu1 %v93_v42  ;;  %228 = vmatpush.msra.mxu3 %v95_v43  ;;  %v321_v0 = vld [vmem:[%s3325_s3 + $0x150] sm:$0xff]  ;;  %v157_v3 = vld [vmem:[%s3324_s2 + $0x2f8] sm:$0xff]  ;;  %v315_v4 = vld [vmem:[%s3325_s3 + $0x120] sm:$0xff]  ;;  %3433 = sst [smem:[#allocation25_spill]] %s2313_s23 }
  0x28   :  { %169 = vmatpush.msra.mxu0 %v86_v44  ;;  %209 = vmatpush.msra.mxu2 %v88_v45  ;;  %v322_v5 = vld [vmem:[%s3325_s3 + $0x158] sm:$0xff]  ;;  %v144_v6 = vld [vmem:[%s3324_s2 + $0x290] sm:$0xff]  ;;  %v151_v7 = vld [vmem:[%s3324_s2 + $0x2c8] sm:$0xff]  ;;  %3434 = sst [smem:[#allocation26_spill]] %s2315_s24 }
  0x29   :  { %189 = vmatpush.msra.mxu1 %v87_v46  ;;  %229 = vmatpush.msra.mxu3 %v89_v47  ;;  %v309_v8 = vld [vmem:[%s3325_s3 + $0xf0] sm:$0xff]  ;;  %v316_v9 = vld [vmem:[%s3325_s3 + $0x128] sm:$0xff]  ;;  %v138_v10 = vld [vmem:[%s3324_s2 + $0x260] sm:$0xff]  ;;  %s2319_s5 = sld [smem:[#allocation2 + $0x46]] }
  0x2a   :  { %170 = vmatpush.msra.mxu0 %v80_v48  ;;  %210 = vmatpush.msra.mxu2 %v82_v49  ;;  %v145_v11 = vld [vmem:[%s3324_s2 + $0x298] sm:$0xff]  ;;  %v303_v12 = vld [vmem:[%s3325_s3 + $0xc0] sm:$0xff]  ;;  %v132_v14 = vld [vmem:[%s3324_s2 + $0x230] sm:$0xff]  ;;  %s2321_s25 = sld [smem:[#allocation2 + $0x5]] }
  0x2b   :  { %190 = vmatpush.msra.mxu1 %v81_v50  ;;  %230 = vmatpush.msra.mxu3 %v83_v51  ;;  %v310_v13 = vld [vmem:[%s3325_s3 + $0xf8] sm:$0xff]  ;;  %v139_v15 = vld [vmem:[%s3324_s2 + $0x268] sm:$0xff]  ;;  %v297_v16 = vld [vmem:[%s3325_s3 + $0x90] sm:$0xff]  ;;  %s2323_s26 = sld [smem:[#allocation2 + $0xf]] }
  0x2c   :  { %171 = vmatpush.msra.mxu0 %v74_v52  ;;  %211 = vmatpush.msra.mxu2 %v76_v53  ;;  %v304_v17 = vld [vmem:[%s3325_s3 + $0xc8] sm:$0xff]  ;;  %v126_v18 = vld [vmem:[%s3324_s2 + $0x200] sm:$0xff]  ;;  %v133_v19 = vld [vmem:[%s3324_s2 + $0x238] sm:$0xff]  ;;  %s2327_s27 = sld [smem:[#allocation2 + $0x23]] }
  0x2d   :  { %191 = vmatpush.msra.mxu1 %v75_v54  ;;  %231 = vmatpush.msra.mxu3 %v77_v55  ;;  %v291_v20 = vld [vmem:[%s3325_s3 + $0x60] sm:$0xff]  ;;  %v298_v21 = vld [vmem:[%s3325_s3 + $0x98] sm:$0xff]  ;;  %v120_v22 = vld [vmem:[%s3324_s2 + $0x1d0] sm:$0xff]  ;;  %s2338_s10 = sld [smem:[#allocation2 + $0x2d]] }
  0x2e   :  { %172 = vmatpush.msra.mxu0 %v68_v56  ;;  %212 = vmatpush.msra.mxu2 %v70_v57  ;;  %v127_v23 = vld [vmem:[%s3324_s2 + $0x208] sm:$0xff]  ;;  %v285_v24 = vld [vmem:[%s3325_s3 + $0x30] sm:$0xff]  ;;  %v114_v26 = vld [vmem:[%s3324_s2 + $0x1a0] sm:$0xff]  ;;  %s2343_s7 = sld [smem:[#allocation2 + $0x37]] }
  0x2f   :  { %192 = vmatpush.msra.mxu1 %v69_v58  ;;  %232 = vmatpush.msra.mxu3 %v71_v59  ;;  %v292_v25 = vld [vmem:[%s3325_s3 + $0x68] sm:$0xff]  ;;  %v121_v27 = vld [vmem:[%s3324_s2 + $0x1d8] sm:$0xff]  ;;  %v2000_v28 = vld [vmem:[%s3322_s0] sm:$0xf]  ;;  %s2295_s0 = sld [smem:[#allocation2 + $0xa]] }
  0x30   :  { %173 = vmatpush.msra.mxu0 %v62_v60  ;;  %213 = vmatpush.msra.mxu2 %v64_v61  ;;  %v286_v29 = vld [vmem:[%s3325_s3 + $0x38] sm:$0xff]  ;;  %v279_v30 = vld [vmem:[%s3325_s3] sm:$0xff]  ;;  %v108_v31 = vld [vmem:[%s3324_s2 + $0x170] sm:$0xff]  ;;  %3436 = sst [smem:[#allocation28_spill]] %s2319_s5 }
  0x31   :  { %193 = vmatpush.msra.mxu1 %v63_v63  ;;  %233 = vmatpush.msra.mxu3 %v65_v1  ;;  %v115_v32 = vld [vmem:[%s3324_s2 + $0x1a8] sm:$0xff]  ;;  %v323_v33 = vld [vmem:[%s3325_s3 + $0x160] sm:$0xff]  ;;  %v109_v36 = vld [vmem:[%s3324_s2 + $0x178] sm:$0xff]  ;;  %3437 = sst [smem:[#allocation29_spill]] %s2321_s25 }
  0x32   :  { %238 = vmatpush.msrb.mxu0 %v156_v62  ;;  %339 = vmatpush.msrb.mxu2 %v321_v0  ;;  %v102_v34 = vld [vmem:[%s3324_s2 + $0x140] sm:$0xff]  ;;  %v280_v35 = vld [vmem:[%s3325_s3 + $0x8] sm:$0xff]  ;;  %v317_v37 = vld [vmem:[%s3325_s3 + $0x130] sm:$0xff]  ;;  %3438 = sst [smem:[#allocation30_spill]] %s2323_s26 }
  0x33   :  { %258 = vmatpush.msrb.mxu1 %v157_v3  ;;  %359 = vmatpush.msrb.mxu3 %v322_v5  ;;  %v324_v38 = vld [vmem:[%s3325_s3 + $0x168] sm:$0xff]  ;;  %v96_v39 = vld [vmem:[%s3324_s2 + $0x110] sm:$0xff]  ;;  %v311_v41 = vld [vmem:[%s3325_s3 + $0x100] sm:$0xff]  ;;  %3440 = sst [smem:[#allocation32_spill]] %s2327_s27 }
  0x34   :  { %239 = vmatpush.msrb.mxu0 %v150_v2  ;;  %340 = vmatpush.msrb.mxu2 %v315_v4  ;;  %v103_v40 = vld [vmem:[%s3324_s2 + $0x148] sm:$0xff]  ;;  %v318_v42 = vld [vmem:[%s3325_s3 + $0x138] sm:$0xff]  ;;  %v90_v44 = vld [vmem:[%s3324_s2 + $0xe0] sm:$0xff]  ;;  %3441 = sst [smem:[#allocation33_spill]] %s2338_s10 }
  0x35   :  { %259 = vmatpush.msrb.mxu1 %v151_v7  ;;  %360 = vmatpush.msrb.mxu3 %v316_v9  ;;  %v97_v43 = vld [vmem:[%s3324_s2 + $0x118] sm:$0xff]  ;;  %v305_v45 = vld [vmem:[%s3325_s3 + $0xd0] sm:$0xff]  ;;  %v312_v46 = vld [vmem:[%s3325_s3 + $0x108] sm:$0xff]  ;;  %3442 = sst [smem:[#allocation34_spill]] %s2343_s7 }
  0x36   :  { %240 = vmatpush.msrb.mxu0 %v144_v6  ;;  %341 = vmatpush.msrb.mxu2 %v309_v8  ;;  %v2061_v47 = vld [vmem:[%s3323_s1] sm:$0xf]  ;;  %v84_v48 = vld [vmem:[%s3324_s2 + $0xb0] sm:$0xff]  ;;  %v91_v49 = vld [vmem:[%s3324_s2 + $0xe8] sm:$0xff]  ;;  %s2325_s1 = sld [smem:[#allocation2 + $0x19]] }
  0x37   :  { %260 = vmatpush.msrb.mxu1 %v145_v11  ;;  %361 = vmatpush.msrb.mxu3 %v310_v13  ;;  %v299_v50 = vld [vmem:[%s3325_s3 + $0xa0] sm:$0xff]  ;;  %v306_v51 = vld [vmem:[%s3325_s3 + $0xd8] sm:$0xff]  ;;  %v293_v54 = vld [vmem:[%s3325_s3 + $0x70] sm:$0xff]  ;;  %s2345_s28 = sld [smem:[#allocation2 + $0x41]] }
  0x38   :  { %241 = vmatpush.msrb.mxu0 %v138_v10  ;;  %342 = vmatpush.msrb.mxu2 %v303_v12  ;;  %v78_v52 = vld [vmem:[%s3324_s2 + $0x80] sm:$0xff]  ;;  %v85_v53 = vld [vmem:[%s3324_s2 + $0xb8] sm:$0xff]  ;;  %v300_v55 = vld [vmem:[%s3325_s3 + $0xa8] sm:$0xff]  ;;  %s2347_s29 = sld [smem:[#allocation2 + $0x4b]] }
  0x39   :  { %261 = vmatpush.msrb.mxu1 %v139_v15  ;;  %362 = vmatpush.msrb.mxu3 %v304_v17  ;;  %v72_v56 = vld [vmem:[%s3324_s2 + $0x50] sm:$0xff]  ;;  %v79_v57 = vld [vmem:[%s3324_s2 + $0x88] sm:$0xff]  ;;  %v287_v58 = vld [vmem:[%s3325_s3 + $0x40] sm:$0xff]  ;;  %s2349_s30 = sld [smem:[#allocation2 + $0x4]] }
  0x3a   :  { %242 = vmatpush.msrb.mxu0 %v132_v14  ;;  %343 = vmatpush.msrb.mxu2 %v297_v16  ;;  %v294_v59 = vld [vmem:[%s3325_s3 + $0x78] sm:$0xff]  ;;  %v66_v60 = vld [vmem:[%s3324_s2 + $0x20] sm:$0xff]  ;;  %v281_v62 = vld [vmem:[%s3325_s3 + $0x10] sm:$0xff]  ;;  %s2351_s11 = sld [smem:[#allocation2 + $0xe]] }
  0x3b   :  { %262 = vmatpush.msrb.mxu1 %v133_v19  ;;  %363 = vmatpush.msrb.mxu3 %v298_v21  ;;  %v73_v61 = vld [vmem:[%s3324_s2 + $0x58] sm:$0xff]  ;;  %v288_v63 = vld [vmem:[%s3325_s3 + $0x48] sm:$0xff]  ;;  %v325_v0 = vld [vmem:[%s3325_s3 + $0x170] sm:$0xff]  ;;  %s2353_s12 = sld [smem:[#allocation2 + $0x18]] }
  0x3c   :  { %243 = vmatpush.msrb.mxu0 %v126_v18  ;;  %344 = vmatpush.msrb.mxu2 %v291_v20  ;;  %v67_v1 = vld [vmem:[%s3324_s2 + $0x28] sm:$0xff]  ;;  %v282_v2 = vld [vmem:[%s3325_s3 + $0x18] sm:$0xff]  ;;  %v319_v3 = vld [vmem:[%s3325_s3 + $0x140] sm:$0xff]  ;;  %s2297_s2 = sld [smem:[#allocation5 + $0x2]] }
  0x3d   :  { %263 = vmatpush.msrb.mxu1 %v127_v23  ;;  %364 = vmatpush.msrb.mxu3 %v292_v25  ;;  %v326_v4 = vld [vmem:[%s3325_s3 + $0x178] sm:$0xff]  ;;  %v313_v6 = vld [vmem:[%s3325_s3 + $0x110] sm:$0xff]  ;;  %v320_v8 = vld [vmem:[%s3325_s3 + $0x148] sm:$0xff]  ;;  %3439 = sst [smem:[#allocation31_spill]] %s2325_s1 }
  0x3e   :  { %244 = vmatpush.msrb.mxu0 %v120_v22  ;;  %345 = vmatpush.msrb.mxu2 %v285_v24  ;;  %v1400_v5 = vld [vmem:[%s3328_s6 + $0xf8] sm:$0xff]  ;;  %v1399_v9 = vld [vmem:[%s3328_s6 + $0xf0] sm:$0xff]  ;;  %v307_v10 = vld [vmem:[%s3325_s3 + $0xe0] sm:$0xff]  ;;  %3443 = sst [smem:[#allocation35_spill]] %s2345_s28 }
  0x3f   :  { %264 = vmatpush.msrb.mxu1 %v121_v27  ;;  %214 = vmatmul.f32.vlgmr.msra.gmra.mxu2 %v2000_v28  ;;  %v530_v7 = vld [vmem:[%s3328_s6 + $0x78] sm:$0xff]  ;;  %v529_v11 = vld [vmem:[%s3328_s6 + $0x70] sm:$0xff]  ;;  %v1398_v13 = vld [vmem:[%s3328_s6 + $0xe8] sm:$0xff]  ;;  %3444 = sst [smem:[#allocation36_spill]] %s2347_s29 }
  0x40   :  { %245 = vmatpush.msrb.mxu0 %v114_v26  ;;  %365 = vmatpush.msrb.mxu3 %v286_v29  ;;  %v314_v12 = vld [vmem:[%s3325_s3 + $0x118] sm:$0xff]  ;;  %v301_v14 = vld [vmem:[%s3325_s3 + $0xb0] sm:$0xff]  ;;  %v528_v15 = vld [vmem:[%s3328_s6 + $0x68] sm:$0xff]  ;;  %3445 = sst [smem:[#allocation37_spill]] %s2349_s30 }
  0x41   :  { %346 = vmatpush.msrb.mxu2 %v279_v30  ;;  %265 = vmatpush.msrb.mxu1 %v115_v32  ;;  %v308_v16 = vld [vmem:[%s3325_s3 + $0xe8] sm:$0xff]  ;;  %v1397_v17 = vld [vmem:[%s3328_s6 + $0xe0] sm:$0xff]  ;;  %v302_v20 = vld [vmem:[%s3325_s3 + $0xb8] sm:$0xff]  ;;  %3446 = sst [smem:[#allocation38_spill]] %s2351_s11 }
  0x42   :  { %246 = vmatpush.msrb.mxu0 %v108_v31  ;;  %234 = vmatmul.f32.vlgmr.msra.gmra.mxu3 %v2000_v28  ;;  %v295_v18 = vld [vmem:[%s3325_s3 + $0x80] sm:$0xff]  ;;  %v1396_v21 = vld [vmem:[%s3328_s6 + $0xd8] sm:$0xff]  ;;  %v289_v22 = vld [vmem:[%s3325_s3 + $0x50] sm:$0xff]  ;;  %3425 = sst [smem:[#allocation17_spill]] %s2297_s2 }
  0x43   :  { %379 = vmatpush.msra.mxu2 %v323_v33  ;;  %366 = vmatpush.msrb.mxu3 %v280_v35  ;;  %v527_v19 = vld [vmem:[%s3328_s6 + $0x60] sm:$0xff]  ;;  %v526_v23 = vld [vmem:[%s3328_s6 + $0x58] sm:$0xff]  ;;  %v296_v24 = vld [vmem:[%s3325_s3 + $0x88] sm:$0xff]  ;;  %3447 = sst [smem:[#allocation39_spill]] %s2353_s12 }
  0x44   :  { %247 = vmatpush.msrb.mxu0 %v102_v34  ;;  %266 = vmatpush.msrb.mxu1 %v109_v36  ;;  %v1395_v25 = vld [vmem:[%s3328_s6 + $0xd0] sm:$0xff]  ;;  %v283_v26 = vld [vmem:[%s3325_s3 + $0x20] sm:$0xff]  ;;  %v1427_v29 = vld [vmem:[%s3328_s6 + $0x178] sm:$0xff]  ;;  %s2355_s13 = sld [smem:[#allocation2 + $0x22]] }
  0x45   :  { %380 = vmatpush.msra.mxu2 %v317_v37  ;;  %399 = vmatpush.msra.mxu3 %v324_v38  ;;  %v525_v27 = vld [vmem:[%s3328_s6 + $0x50] sm:$0xff]  ;;  %v1394_v30 = vld [vmem:[%s3328_s6 + $0xc8] sm:$0xff]  ;;  %v1454_v34 = vld [vmem:[%s3328_s6 + $0x1f8] sm:$0xff]  ;;  %s2363_s28 = sld [smem:[#allocation2 + $0x2c]] }
  0x46   :  { %248 = vmatpush.msrb.mxu0 %v96_v39  ;;  %267 = vmatpush.msrb.mxu1 %v103_v40  ;;  %v284_v31 = vld [vmem:[%s3325_s3 + $0x28] sm:$0xff]  ;;  %v1426_v33 = vld [vmem:[%s3328_s6 + $0x170] sm:$0xff]  ;;  %v1393_v35 = vld [vmem:[%s3328_s6 + $0xc0] sm:$0xff]  ;;  %s2374_s27 = sld [smem:[#allocation2 + $0x36]] }
  0x47   :  { %381 = vmatpush.msra.mxu2 %v311_v41  ;;  %400 = vmatpush.msra.mxu3 %v318_v42  ;;  %v524_v32 = vld [vmem:[%s3328_s6 + $0x48] sm:$0xff]  ;;  %v523_v37 = vld [vmem:[%s3328_s6 + $0x40] sm:$0xff]  ;;  %v1453_v38 = vld [vmem:[%s3328_s6 + $0x1f0] sm:$0xff]  ;;  %s2397_s11 = sld [smem:[#allocation2 + $0x40]] }
  0x48   :  { %174 = vmatmul.f32.vlgmr.msra.gmra.mxu0 %v2000_v28  ;;  %268 = vmatpush.msrb.mxu1 %v97_v43  ;;  %v1425_v36 = vld [vmem:[%s3328_s6 + $0x168] sm:$0xff]  ;;  %v1392_v39 = vld [vmem:[%s3328_s6 + $0xb8] sm:$0xff]  ;;  %v1424_v40 = vld [vmem:[%s3328_s6 + $0x160] sm:$0xff]  ;;  %s2413_s9 = sld [smem:[#allocation2 + $0xc]] }
  0x49   :  { %249 = vmatpush.msrb.mxu0 %v90_v44  ;;  %382 = vmatpush.msra.mxu2 %v305_v45  ;;  %v522_v41 = vld [vmem:[%s3328_s6 + $0x38] sm:$0xff]  ;;  %v1452_v42 = vld [vmem:[%s3328_s6 + $0x1e8] sm:$0xff]  ;;  %v1451_v44 = vld [vmem:[%s3328_s6 + $0x1e0] sm:$0xff]  ;;  %s2425_s10 = sld [smem:[#allocation2 + $0xd]] }
  0x4a   :  { %401 = vmatpush.msra.mxu3 %v312_v46  ;;  %1359 = vmatmul.msk.f32.vlgmr.msrb.gmra.mxu2 %vm327_vm0, %v2061_v47  ;;  %v1423_v43 = vld [vmem:[%s3328_s6 + $0x158] sm:$0xff]  ;;  %v1422_v45 = vld [vmem:[%s3328_s6 + $0x150] sm:$0xff]  ;;  %3448 = sst [smem:[#allocation40_spill]] %s2355_s13 }
  0x4b   :  { %194 = vmatmul.f32.vlgmr.msra.gmra.mxu1 %v2000_v28  ;;  %250 = vmatpush.msrb.mxu0 %v84_v48  ;;  %v1450_v46 = vld [vmem:[%s3328_s6 + $0x1d8] sm:$0xff]  ;;  %v1449_v48 = vld [vmem:[%s3328_s6 + $0x1d0] sm:$0xff]  ;;  %3449 = sst [smem:[#allocation41_spill]] %s2363_s28 }
  0x4c   :  { %269 = vmatpush.msrb.mxu1 %v91_v49  ;;  %383 = vmatpush.msra.mxu2 %v299_v50  ;;  %v1420_v49 = vld [vmem:[%s3328_s6 + $0x140] sm:$0xff]  ;;  %v1448_v50 = vld [vmem:[%s3328_s6 + $0x1c8] sm:$0xff]  ;;  %3450 = sst [smem:[#allocation42_spill]] %s2374_s27 }
  0x4d   :  { %402 = vmatpush.msra.mxu3 %v306_v51  ;;  %251 = vmatpush.msrb.mxu0 %v78_v52  ;;  %v1419_v51 = vld [vmem:[%s3328_s6 + $0x138] sm:$0xff]  ;;  %v1447_v52 = vld [vmem:[%s3328_s6 + $0x1c0] sm:$0xff]  ;;  %s2385_s13 = sld [smem:[#allocation2 + $0xb]] }
  0x4e   :  { %1360 = vmatmul.msk.f32.vlgmr.msrb.gmra.mxu3 %vm327_vm0, %v2061_v47  ;;  %270 = vmatpush.msrb.mxu1 %v85_v53  ;;  %v1446_v53 = vld [vmem:[%s3328_s6 + $0x1b8] sm:$0xff]  ;;  %3451 = sst [smem:[#allocation43_spill]] %s2397_s11 }
  0x4f   :  { %384 = vmatpush.msra.mxu2 %v293_v54  ;;  %403 = vmatpush.msra.mxu3 %v300_v55  ;;  %v1391_v54 = vld [vmem:[%s3328_s6 + $0xb0] sm:$0xff]  ;;  %s2405_s27 = sld [smem:[#allocation2 + $0x4a]] }
  0x50   :  { %252 = vmatpush.msrb.mxu0 %v72_v56  ;;  %271 = vmatpush.msrb.mxu1 %v79_v57  ;;  %v521_v55 = vld [vmem:[%s3328_s6 + $0x30] sm:$0xff]  ;;  %s2445_s8 = sld [smem:[#allocation2 + $0x11]] }
  0x51   :  { %385 = vmatpush.msra.mxu2 %v287_v58  ;;  %404 = vmatpush.msra.mxu3 %v294_v59  ;;  %v1418_v56 = vld [vmem:[%s3328_s6 + $0x130] sm:$0xff]  ;;  %v1390_v58 = vld [vmem:[%s3328_s6 + $0xa8] sm:$0xff]  ;;  %s3456_s12 = sld [smem:[#allocation32_spill]] }
  0x52   :  { %253 = vmatpush.msrb.mxu0 %v66_v60  ;;  %272 = vmatpush.msrb.mxu1 %v73_v61  ;;  %v1445_v57 = vld [vmem:[%s3328_s6 + $0x1b0] sm:$0xff]  ;;  %v520_v59 = vld [vmem:[%s3328_s6 + $0x28] sm:$0xff]  ;;  %s2499_s30 = sld [smem:[#allocation2 + $0x6]] }
  0x53   :  { %386 = vmatpush.msra.mxu2 %v281_v62  ;;  %405 = vmatpush.msra.mxu3 %v288_v63  ;;  %v1417_v60 = vld [vmem:[%s3328_s6 + $0x128] sm:$0xff]  ;;  %v1389_v62 = vld [vmem:[%s3328_s6 + $0xa0] sm:$0xff]  ;;  %s2970_s29 = sld [smem:[#allocation2 + $0x21]] }
  0x54   :  { %254 = vmatmul.f32.vlgmr.msrb.gmra.mxu0 %v2000_v28  ;;  %1361 = vmatmul.msk.f32.vlgmr.msra.gmra.mxu2 %vm327_vm0, %v2061_v47  ;;  %v1444_v61 = vld [vmem:[%s3328_s6 + $0x1a8] sm:$0xff]  ;;  %v519_v63 = vld [vmem:[%s3328_s6 + $0x20] sm:$0xff] }
  0x55   :  { %419 = vmatpush.msra.mxu0 %v325_v0  ;;  %273 = vmatpush.msrb.mxu1 %v67_v1  ;;  %v1416_v0 = vld [vmem:[%s3328_s6 + $0x120] sm:$0xff]  ;;  %3452 = sst [smem:[#allocation44_spill]] %s2405_s27 }
  0x56   :  { %406 = vmatpush.msra.mxu3 %v282_v2  ;;  %274 = vmatmul.f32.vlgmr.msrb.gmra.mxu1 %v2000_v28  ;;  %v290_v28 = vld [vmem:[%s3325_s3 + $0x58] sm:$0xff]  ;;  %s2317_s3 = sld [smem:[#allocation5 + $0x7]]  ;;  %v1443_v1 = vld [vmem:[%s3328_s6 + $0x1a0] sm:$0xff]  ;;  %v457_v2 = vstv %s2289_s14 }
  0x57   :  { %1362 = vmatmul.msk.f32.vlgmr.msra.gmra.mxu3 %vm327_vm0, %v2061_v47  ;;  %420 = vmatpush.msra.mxu0 %v319_v3  ;;  %v1388_v3 = vld [vmem:[%s3328_s6 + $0x98] sm:$0xff]  ;;  %3454 = sst [smem:[#allocation46_spill]] %s2445_s8 }
  0x58   :  { %439 = vmatpush.msra.mxu1 %v326_v4  ;;  %612 = vmatpush.msrb.mxu2 %v1400_v5  ;;  %v518_v4 = vld [vmem:[%s3328_s6 + $0x18] sm:$0xff]  ;;  %s2451_s14 = sld [smem:[#allocation2 + $0x12]] }
  0x59   :  { %421 = vmatpush.msra.mxu0 %v313_v6  ;;  %632 = vmatpush.msrb.mxu3 %v530_v7  ;;  %v1415_v5 = vld [vmem:[%s3328_s6 + $0x118] sm:$0xff]  ;;  %v459_v6 = vstv %s2291_s15  ;;  %v537_v7 = vstv %s2295_s0  ;;  %s2487_s15 = sld [smem:[#allocation2 + $0x3]] }
  0x5a   :  { %440 = vmatpush.msra.mxu1 %v320_v8  ;;  %613 = vmatpush.msrb.mxu2 %v1399_v9  ;;  %v539_v8 = vstv %s2293_s16  ;;  %v1442_v9 = vld [vmem:[%s3328_s6 + $0x198] sm:$0xff]  ;;  %s2475_s16 = sld [smem:[#allocation2 + $0x2]] }
  0x5b   :  { %422 = vmatpush.msra.mxu0 %v307_v10  ;;  %633 = vmatpush.msrb.mxu3 %v529_v11  ;;  %v3402_v10 = vstv %s2299_s17  ;;  %v660_v11 = vstv %s2297_s2  ;;  %s2437_s2 = sld [smem:[#allocation2 + $0x10]] }
  0x5c   :  { %441 = vmatpush.msra.mxu1 %v314_v12  ;;  %614 = vmatpush.msrb.mxu2 %v1398_v13  ;;  %3435 = sst [smem:[#allocation27_spill]] %s2317_s3  ;;  %v3397_v12 = vstv %s2303_s19  ;;  %v1387_v13 = vld [vmem:[%s3328_s6 + $0x90] sm:$0xff] }
  0x5d   :  { %423 = vmatpush.msra.mxu0 %v301_v14  ;;  %634 = vmatpush.msrb.mxu3 %v528_v15  ;;  %v3409_v14 = vstv %s2301_s18  ;;  %v517_v15 = vld [vmem:[%s3328_s6 + $0x10] sm:$0xff]  ;;  %s3458_s18 = sld [smem:[#allocation35_spill]] }
  0x5e   :  { %442 = vmatpush.msra.mxu1 %v308_v16  ;;  %615 = vmatpush.msrb.mxu2 %v1397_v17  ;;  %v1414_v16 = vld [vmem:[%s3328_s6 + $0x110] sm:$0xff]  ;;  %3455 = sst [smem:[#allocation47_spill]] %s2451_s14 }
  0x5f   :  { %424 = vmatpush.msra.mxu0 %v295_v18  ;;  %635 = vmatpush.msrb.mxu3 %v527_v19  ;;  %v1441_v17 = vld [vmem:[%s3328_s6 + $0x190] sm:$0xff]  ;;  %v3395_v18 = vstv %s2307_s21  ;;  %v1386_v19 = vld [vmem:[%s3328_s6 + $0x88] sm:$0xff]  ;;  %3460 = sst [smem:[#allocation48_spill]] %s2499_s30 }
  0x60   :  { %443 = vmatpush.msra.mxu1 %v302_v20  ;;  %616 = vmatpush.msrb.mxu2 %v1396_v21  ;;  %v516_v20 = vld [vmem:[%s3328_s6 + $0x8] sm:$0xff]  ;;  %s2549_s19 = sld [smem:[#allocation2 + $0x7]] }
  0x61   :  { %425 = vmatpush.msra.mxu0 %v289_v22  ;;  %636 = vmatpush.msrb.mxu3 %v526_v23  ;;  %v1413_v21 = vld [vmem:[%s3328_s6 + $0x108] sm:$0xff]  ;;  %3453 = sst [smem:[#allocation45_spill]] %s2437_s2  ;;  %v3406_v22 = vstv %s2305_s20  ;;  %v3396_v23 = vstv %s2311_s4 }
  0x62   :  { %444 = vmatpush.msra.mxu1 %v296_v24  ;;  %617 = vmatpush.msrb.mxu2 %v1395_v25  ;;  %v3405_v24 = vstv %s2309_s22  ;;  %v1440_v25 = vld [vmem:[%s3328_s6 + $0x188] sm:$0xff]  ;;  %s3457_s20 = sld [smem:[#allocation33_spill]] }
  0x63   :  { %426 = vmatpush.msra.mxu0 %v283_v26  ;;  %637 = vmatpush.msrb.mxu3 %v525_v27  ;;  %v3401_v26 = vstv %s2315_s24  ;;  %v3408_v27 = vstv %s2313_s23  ;;  %s3464_s24 = sld [smem:[#allocation39_spill]] }
  0x64   :  { %445 = vmatpush.msra.mxu1 %v290_v28  ;;  %1363 = vmatmul.msk.f32.vlgmr.msra.gmra.mxu0 %vm327_vm0, %v2061_v47  ;;  %v3400_v28 = vstv %s2319_s5  ;;  %s3461_s5 = sld [smem:[#allocation37_spill]] }
  0x65   :  { %733 = vmatpush.msrb.mxu0 %v1427_v29  ;;  %618 = vmatpush.msrb.mxu2 %v1394_v30  ;;  %v3407_v29 = vstv %s2317_s3  ;;  %v1385_v30 = vld [vmem:[%s3328_s6 + $0x80] sm:$0xff]  ;;  %s2463_s3 = sld [smem:[#allocation2 + $0x1]] }
  0x66   :  { %446 = vmatpush.msra.mxu1 %v284_v31  ;;  %638 = vmatpush.msrb.mxu3 %v524_v32  ;;  %v515_v31 = vld [vmem:[%s3328_s6] sm:$0xff]  ;;  %s3465_s22 = sld [smem:[#allocation40_spill]] }
  0x67   :  { %1364 = vmatmul.msk.f32.vlgmr.msra.gmra.mxu1 %vm327_vm0, %v2061_v47  ;;  %734 = vmatpush.msrb.mxu0 %v1426_v33  ;;  %v1421_v47 = vld [vmem:[%s3328_s6 + $0x148] sm:$0xff]  ;;  %v1412_v32 = vld [vmem:[%s3328_s6 + $0x100] sm:$0xff]  ;;  %v541_v33 = vstv %s2385_s13  ;;  %s2529_s23 = sld [smem:[#allocation2 + $0x17]] }
  0x68   :  { %835 = vmatpush.msrb.mxu1 %v1454_v34  ;;  %619 = vmatpush.msrb.mxu2 %v1393_v35  ;;  %v488_v34 = vstv %s2321_s25  ;;  %v1439_v35 = vld [vmem:[%s3328_s6 + $0x180] sm:$0xff]  ;;  %s2509_s25 = sld [smem:[#allocation2 + $0x15]] }
  0x69   :  { %735 = vmatpush.msrb.mxu0 %v1425_v36  ;;  %639 = vmatpush.msrb.mxu3 %v523_v37  ;;  %v1481_v36 = vld [vmem:[%s3328_s6 + $0x278] sm:$0xff]  ;;  %3468 = sst [smem:[#allocation51_spill]] %s2549_s19 }
  0x6a   :  { %836 = vmatpush.msrb.mxu1 %v1453_v38  ;;  %620 = vmatpush.msrb.mxu2 %v1392_v39  ;;  %v1508_v37 = vld [vmem:[%s3328_s6 + $0x2f8] sm:$0xff]  ;;  %v568_v38 = vstv %s2323_s26  ;;  %s2590_s21 = sld [smem:[#allocation2 + $0x8]] }
  0x6b   :  { %736 = vmatpush.msrb.mxu0 %v1424_v40  ;;  %640 = vmatpush.msrb.mxu3 %v522_v41  ;;  %v1535_v39 = vld [vmem:[%s3328_s6 + $0x378] sm:$0xff]  ;;  %v1480_v41 = vld [vmem:[%s3328_s6 + $0x270] sm:$0xff]  ;;  %s2598_s4 = sld [smem:[#allocation2 + $0x13]] }
  0x6c   :  { %837 = vmatpush.msrb.mxu1 %v1452_v42  ;;  %621 = vmatpush.msrb.mxu2 %v1391_v54  ;;  %v1562_v40 = vld [vmem:[%s3328_s6 + $0x3f8] sm:$0xff]  ;;  %v3410_v42 = vstv %s2325_s1  ;;  %s3462_s1 = sld [smem:[#allocation38_spill]] }
  0x6d   :  { %737 = vmatpush.msrb.mxu0 %v1423_v43  ;;  %641 = vmatpush.msrb.mxu3 %v521_v55  ;;  %v1507_v43 = vld [vmem:[%s3328_s6 + $0x2f0] sm:$0xff]  ;;  %v1478_v55 = vld [vmem:[%s3328_s6 + $0x260] sm:$0xff]  ;;  %s2607_s26 = sld [smem:[#allocation2 + $0x9]]  ;;  %v1473_v54 = vld [vmem:[%s3328_s6 + $0x238] sm:$0xff] }
  0x6e   :  { %838 = vmatpush.msrb.mxu1 %v1451_v44  ;;  %622 = vmatpush.msrb.mxu2 %v1390_v58  ;;  %v1534_v44 = vld [vmem:[%s3328_s6 + $0x370] sm:$0xff]  ;;  %v470_v58 = vstv %s3461_s5  ;;  %s2643_s14 = sld [smem:[#allocation2 + $0x1b]] }
  0x6f   :  { %738 = vmatpush.msrb.mxu0 %v1422_v45  ;;  %642 = vmatpush.msrb.mxu3 %v520_v59  ;;  %v1561_v45 = vld [vmem:[%s3328_s6 + $0x3f0] sm:$0xff]  ;;  %v1532_v59 = vld [vmem:[%s3328_s6 + $0x360] sm:$0xff]  ;;  %s3486_s13 = sld [smem:[#allocation32_spill]] }
  0x70   :  { %839 = vmatpush.msrb.mxu1 %v1450_v46  ;;  %623 = vmatpush.msrb.mxu2 %v1389_v62  ;;  %v3412_v46 = vstv %s3456_s12  ;;  %s2519_s12 = sld [smem:[#allocation2 + $0x16]] }
  0x71   :  { %739 = vmatpush.msrb.mxu0 %v1421_v47  ;;  %643 = vmatpush.msrb.mxu3 %v519_v63  ;;  %v3411_v47 = vstv %s3457_s20  ;;  %v671_v63 = vstv %s3464_s24  ;;  %s2630_s24 = sld [smem:[#allocation2 + $0x1a]] }
  0x72   :  { %840 = vmatpush.msrb.mxu1 %v1449_v48  ;;  %624 = vmatpush.msrb.mxu2 %v1388_v3  ;;  %v1479_v48 = vld [vmem:[%s3328_s6 + $0x268] sm:$0xff]  ;;  %v550_v62 = vstv %s3462_s1  ;;  %v773_v3 = vstv %s3465_s22  ;;  %s2727_s22 = sld [smem:[#allocation2 + $0x20]] }
  0x73   :  { %740 = vmatpush.msrb.mxu0 %v1420_v49  ;;  %644 = vmatpush.msrb.mxu3 %v518_v4  ;;  %v1506_v49 = vld [vmem:[%s3328_s6 + $0x2e8] sm:$0xff]  ;;  %v875_v4 = vstv %s2363_s28  ;;  %s3487_s0 = sld [smem:[#allocation33_spill]] }
  0x74   :  { %841 = vmatpush.msrb.mxu1 %v1448_v50  ;;  %625 = vmatpush.msrb.mxu2 %v1387_v13  ;;  %v3413_v50 = vstv %s2343_s7  ;;  %s2539_s7 = sld [smem:[#allocation2 + $0x1f]] }
  0x75   :  { %741 = vmatpush.msrb.mxu0 %v1419_v51  ;;  %645 = vmatpush.msrb.mxu3 %v517_v15  ;;  %v3414_v51 = vstv %s3458_s18  ;;  %s3466_s18 = sld [smem:[#allocation42_spill]]  ;;  %v3415_v15 = vstv %s2397_s11 }
  0x76   :  { %842 = vmatpush.msrb.mxu1 %v1447_v52  ;;  %626 = vmatpush.msrb.mxu2 %v1386_v19  ;;  %v1533_v52 = vld [vmem:[%s3328_s6 + $0x368] sm:$0xff]  ;;  %3463 = sst [smem:[#allocation49_spill]] %s2519_s12  ;;  %v3416_v19 = vstv %s2405_s27 }
  0x77   :  { %742 = vmatpush.msrb.mxu0 %v1418_v56  ;;  %646 = vmatpush.msrb.mxu3 %v516_v20  ;;  %v1505_v56 = vld [vmem:[%s3328_s6 + $0x2e0] sm:$0xff]  ;;  %v1530_v20 = vld [vmem:[%s3328_s6 + $0x350] sm:$0xff]  ;;  %s2686_s11 = sld [smem:[#allocation2 + $0x1c]] }
  0x78   :  { %843 = vmatpush.msrb.mxu1 %v1446_v53  ;;  %627 = vmatpush.msrb.mxu2 %v1385_v30  ;;  %v1560_v53 = vld [vmem:[%s3328_s6 + $0x3e8] sm:$0xff]  ;;  %s3489_s27 = sld [smem:[#allocation35_spill]] }
  0x79   :  { %743 = vmatpush.msrb.mxu0 %v1417_v60  ;;  %647 = vmatpush.msrb.mxu3 %v515_v31  ;;  %v1559_v60 = vld [vmem:[%s3328_s6 + $0x3e0] sm:$0xff]  ;;  %v1475_v30 = vld [vmem:[%s3328_s6 + $0x248] sm:$0xff]  ;;  %s3010_s20 = sld [smem:[#allocation2 + $0x25]] }
  0x7a   :  { %844 = vmatpush.msrb.mxu1 %v1445_v57  ;;  %937 = vmatpush.msra.mxu2 %v1481_v36  ;;  %v544_v57 = vstv %s2413_s9  ;;  %3467 = sst [smem:[#allocation50_spill]] %s2539_s7  ;;  %v1502_v31 = vld [vmem:[%s3328_s6 + $0x2c8] sm:$0xff] }
  0x7b   :  { %744 = vmatpush.msrb.mxu0 %v1416_v0  ;;  %1039 = vmatpush.msra.mxu3 %v1508_v37  ;;  %v1477_v0 = vld [vmem:[%s3328_s6 + $0x258] sm:$0xff]  ;;  %v977_v13 = vstv %s3466_s18  ;;  %v1529_v36 = vld [vmem:[%s3328_s6 + $0x348] sm:$0xff]  ;;  %s3485_s9 = sld [smem:[#allocation31_spill]] }
  0x7c   :  { %845 = vmatpush.msrb.mxu1 %v1444_v61  ;;  %938 = vmatpush.msra.mxu2 %v1480_v41  ;;  %v547_v61 = vstv %s2425_s10  ;;  %v1556_v37 = vld [vmem:[%s3328_s6 + $0x3c8] sm:$0xff]  ;;  %s3502_s10 = sld [smem:[#allocation47_spill]] }
  0x7d   :  { %745 = vmatpush.msrb.mxu0 %v1415_v5  ;;  %1040 = vmatpush.msra.mxu3 %v1507_v43  ;;  %v1531_v5 = vld [vmem:[%s3328_s6 + $0x358] sm:$0xff]  ;;  %v1474_v43 = vld [vmem:[%s3328_s6 + $0x240] sm:$0xff]  ;;  %s3504_s7 = sld [smem:[#allocation49_spill]] }
  0x7e   :  { %846 = vmatpush.msrb.mxu1 %v1443_v1  ;;  %939 = vmatpush.msra.mxu2 %v1479_v48  ;;  %v1504_v1 = vld [vmem:[%s3328_s6 + $0x2d8] sm:$0xff]  ;;  %v3403_v48 = vstv %s2519_s12  ;;  %s3488_s12 = sld [smem:[#allocation34_spill]] }
  0x7f   :  { %746 = vmatpush.msrb.mxu0 %v1414_v16  ;;  %1041 = vmatpush.msra.mxu3 %v1506_v49  ;;  %v1476_v16 = vld [vmem:[%s3328_s6 + $0x250] sm:$0xff]  ;;  %v1501_v49 = vld [vmem:[%s3328_s6 + $0x2c0] sm:$0xff]  ;;  %s3075_s1 = sld [smem:[#allocation2 + $0x2b]] }
  0x80   :  { %847 = vmatpush.msrb.mxu1 %v1442_v9  ;;  %940 = vmatpush.msra.mxu2 %v1478_v55  ;;  %v1558_v9 = vld [vmem:[%s3328_s6 + $0x3d8] sm:$0xff]  ;;  %s3100_s28 = sld [smem:[#allocation2 + $0x2e]] }
  0x81   :  { %747 = vmatpush.msrb.mxu0 %v1413_v21  ;;  %1042 = vmatpush.msra.mxu3 %v1505_v56  ;;  %v1557_v21 = vld [vmem:[%s3328_s6 + $0x3d0] sm:$0xff]  ;;  %s3138_s17 = sld [smem:[#allocation2 + $0x34]] }
  0x82   :  { %848 = vmatpush.msrb.mxu1 %v1441_v17  ;;  %v1503_v17 = vld [vmem:[%s3328_s6 + $0x2d0] sm:$0xff]  ;;  %941 = vmatpush.msra.mxu2 %v1477_v0  ;;  %s3152_s18 = sld [smem:[#allocation2 + $0x38]] }
  0x83   :  { %748 = vmatpush.msrb.mxu0 %v1412_v32  ;;  %1043 = vmatpush.msra.mxu3 %v1504_v1  ;;  %v464_v32 = vstv %s2475_s16  ;;  %s3496_s16 = sld [smem:[#allocation43_spill]] }
  0x84   :  { %849 = vmatpush.msrb.mxu1 %v1440_v25  ;;  %v461_v25 = vstv %s2463_s3  ;;  %942 = vmatpush.msra.mxu2 %v1476_v16  ;;  %s3524_s3 = sld [smem:[#allocation20_spill]] }
  0x85   :  { %1141 = vmatpush.msra.mxu0 %v1535_v39  ;;  %1044 = vmatpush.msra.mxu3 %v1503_v17  ;;  %v571_v39 = vstv %s2437_s2  ;;  %s3057_s2 = sld [smem:[#allocation2 + $0x29]] }
  0x86   :  { %850 = vmatpush.msrb.mxu1 %v1439_v35  ;;  %v467_v35 = vstv %s2487_s15  ;;  %943 = vmatpush.msra.mxu2 %v1475_v30  ;;  %s3503_s15 = sld [smem:[#allocation18_spill]] }
  0x87   :  { %1142 = vmatpush.msra.mxu0 %v1534_v44  ;;  %v574_v44 = vstv %s2445_s8  ;;  %1045 = vmatpush.msra.mxu3 %v1502_v31  ;;  %s2708_s8 = sld [smem:[#allocation2 + $0x1d]] }
  0x88   :  { %1243 = vmatpush.msra.mxu1 %v1562_v40  ;;  %v662_v40 = vstv %s2509_s25  ;;  %944 = vmatpush.msra.mxu2 %v1474_v43  ;;  %s3497_s25 = sld [smem:[#allocation44_spill]] }
  0x89   :  { %1143 = vmatpush.msra.mxu0 %v1533_v52  ;;  %1046 = vmatpush.msra.mxu3 %v1501_v49  ;;  %v1554_v49 = vld [vmem:[%s3328_s6 + $0x3b8] sm:$0xff]  ;;  %v1472_v52 = vld [vmem:[%s3328_s6 + $0x230] sm:$0xff]  ;;  %s3539_s5 = sld [smem:[#allocation23_spill]] }
  0x8a   :  { %1244 = vmatpush.msra.mxu1 %v1561_v45  ;;  %v491_v45 = vstv %s2499_s30  ;;  %945 = vmatpush.msra.mxu2 %v1473_v54  ;;  %v497_v54 = vstv %s2590_s21  ;;  %s3131_s30 = sld [smem:[#allocation2 + $0x33]] }
  0x8b   :  { %1144 = vmatpush.msra.mxu0 %v1532_v59  ;;  %v1528_v59 = vld [vmem:[%s3328_s6 + $0x340] sm:$0xff]  ;;  %s3544_s21 = sld [smem:[#allocation25_spill]] }
  0x8c   :  { %1245 = vmatpush.msra.mxu1 %v1560_v53  ;;  %v3417_v53 = vstv %s2529_s23  ;;  %946 = vmatpush.msra.mxu2 %v1472_v52 }
  0x8d   :  { %1145 = vmatpush.msra.mxu0 %v1531_v5  ;;  %v494_v5 = vstv %s2549_s19  ;;  %s3526_s19 = sld [smem:[#allocation19_spill]] }
  0x8e   :  { %1246 = vmatpush.msra.mxu1 %v1559_v60 }
  0x8f   :  { %1146 = vmatpush.msra.mxu0 %v1530_v20 }
  0x90   :  { %1247 = vmatpush.msra.mxu1 %v1558_v9 }
  0x91   :  { %1147 = vmatpush.msra.mxu0 %v1529_v36 }
  0x92   :  { %1248 = vmatpush.msra.mxu1 %v1557_v21  ;;  %v1555_v21 = vld [vmem:[%s3328_s6 + $0x3c0] sm:$0xff] }
  0x93   :  { %1148 = vmatpush.msra.mxu0 %v1528_v59 }
  0x94   :  { %1249 = vmatpush.msra.mxu1 %v1556_v37 }
  0x96   :  { %1250 = vmatpush.msra.mxu1 %v1555_v21  ;;  %v1553_v21 = vld [vmem:[%s3328_s6 + $0x3b0] sm:$0xff] }
  0x98   :  { %1251 = vmatpush.msra.mxu1 %v1554_v49 }
  0x9a   :  { %1252 = vmatpush.msra.mxu1 %v1553_v21  ;;  %v1497_v21 = vld [vmem:[%s3328_s6 + $0x2a0] sm:$0xff] }
  0xc2   :  { %v2593_v41 = vpop.f32.mrf.mxu2 }
  0xc3   :  { %v2617_v60 = vmul.f32 %v544_v57, %v2593_v41  ;;  %v2622_v0 = vmul.f32 %v541_v33, %v2593_v41  ;;  %v2627_v1 = vmul.f32 %v464_v32, %v2593_v41  ;;  %v2684_v59 = vmul.f32 %v662_v40, %v2593_v41 }
  0xc5   :  { %v175_v56 = vpop.f32.mrf.mxu0  ;;  %v2653_v43 = vpop.f32.mrf.mxu3 }
  0xc6   :  { %v458_v9 = vmul.f32 %v457_v2, %v175_v56  ;;  %v538_v16 = vmul.f32 %v537_v7, %v175_v56  ;;  %v659_v17 = vmul.f32 %v3402_v10, %v175_v56  ;;  %v761_v20 = vmul.f32 %v3397_v12, %v175_v56 }
  0xc7   :  { %v863_v30 = vmul.f32 %v3395_v18, %v175_v56  ;;  %v965_v31 = vmul.f32 %v3396_v23, %v175_v56  ;;  %v1067_v36 = vmul.f32 %v3401_v26, %v175_v56  ;;  %v1169_v37 = vmul.f32 %v3400_v28, %v175_v56  ;;  %v1500_v18 = vld [vmem:[%s3328_s6 + $0x2b8] sm:$0xff] }
  0xc8   :  { %v460_v23 = vadd.f32 %v459_v6, %v458_v9  ;;  %v2663_v12 = vpop.f32.mrf.mxu1  ;;  %v1527_v56 = vld [vmem:[%s3328_s6 + $0x338] sm:$0xff]  ;;  %v2674_v28 = vmul.f32 %v461_v25, %v2593_v41  ;;  %v2679_v26 = vmul.f32 %v3403_v48, %v2593_v41  ;;  %v540_v9 = vadd.f32 %v539_v8, %v538_v16  ;;  %v1499_v16 = vld [vmem:[%s3328_s6 + $0x2b0] sm:$0xff]  ;;  %1047 = vmatpush.msra.mxu3 %v1500_v18 }
  0xc9   :  { %v2692_v55 = vadd.f32 %v660_v11, %v659_v17  ;;  %v2696_v10 = vadd.f32 %v3409_v14, %v761_v20  ;;  %v2700_v48 = vadd.f32 %v3406_v22, %v863_v30  ;;  %v2712_v17 = vadd.f32 %v3405_v24, %v965_v31  ;;  %v1526_v20 = vld [vmem:[%s3328_s6 + $0x330] sm:$0xff]  ;;  %1149 = vmatpush.msra.mxu0 %v1527_v56 }
  0xca   :  { %v542_v30 = vmul.f32 %v541_v33, %v2663_v12  ;;  %v553_v31 = vmul.f32 %v537_v7, %v2663_v12  ;;  %v2731_v18 = vadd.f32 %v3408_v27, %v1067_v36  ;;  %v2735_v24 = vadd.f32 %v3407_v29, %v1169_v37  ;;  %v1471_v33 = vld [vmem:[%s3328_s6 + $0x228] sm:$0xff]  ;;  %1048 = vmatpush.msra.mxu3 %v1499_v16 }
  0xcb   :  { %v462_v7 = vmul.f32 %v461_v25, %v2663_v12  ;;  %v1498_v36 = vld [vmem:[%s3328_s6 + $0x2a8] sm:$0xff]  ;;  %v548_v37 = vmul.f32 %v547_v61, %v2653_v43  ;;  %v557_v56 = vmul.f32 %v544_v57, %v2653_v43  ;;  %v2756_v49 = vmul.f32 %v467_v35, %v2653_v43  ;;  %1150 = vmatpush.msra.mxu0 %v1526_v20  ;;  %v1470_v20 = vld [vmem:[%s3328_s6 + $0x220] sm:$0xff] }
  0xcc   :  { %v1525_v16 = vld [vmem:[%s3328_s6 + $0x328] sm:$0xff]  ;;  %v543_v29 = vadd.f32 %v542_v30, %v540_v9  ;;  %v554_v27 = vadd.f32 %v553_v31, %v539_v8  ;;  %947 = vmatpush.msra.mxu2 %v1471_v33  ;;  %v473_v22 = vmul.f32 %v457_v2, %v2663_v12  ;;  %v477_v8 = vmul.f32 %v464_v32, %v2653_v43  ;;  %v1524_v32 = vld [vmem:[%s3328_s6 + $0x320] sm:$0xff] }
  0xcd   :  { %v2759_v52 = vpop.f32.mrf.mxu2  ;;  %v1552_v57 = vld [vmem:[%s3328_s6 + $0x3a8] sm:$0xff]  ;;  %v463_v14 = vadd.f32 %v462_v7, %v460_v23  ;;  %v663_v23 = vmul.f32 %v662_v40, %v2663_v12  ;;  %1049 = vmatpush.msra.mxu3 %v1498_v36  ;;  %1151 = vmatpush.msra.mxu0 %v1525_v16  ;;  %v1551_v36 = vld [vmem:[%s3328_s6 + $0x3a0] sm:$0xff] }
  0xce   :  { %v2789_v30 = vmul.f32 %v488_v34, %v2759_v52  ;;  %v569_v31 = vmul.f32 %v568_v38, %v2759_v52  ;;  %v2797_v33 = vmul.f32 %v3410_v42, %v2759_v52  ;;  %v2802_v2 = vmul.f32 %v3412_v46, %v2759_v52  ;;  %1253 = vmatpush.msra.mxu1 %v1552_v57 }
  0xcf   :  { %v2810_v40 = vmul.f32 %v3411_v47, %v2759_v52  ;;  %v2815_v7 = vmul.f32 %v3413_v50, %v2759_v52  ;;  %v2820_v42 = vmul.f32 %v3414_v51, %v2759_v52  ;;  %948 = vmatpush.msra.mxu2 %v1470_v20  ;;  %1050 = vmatpush.msra.mxu3 %v1497_v21 }
  0xd0   :  { %v546_v16 = vadd.f32 %v2617_v60, %v543_v29  ;;  %v556_v57 = vadd.f32 %v2622_v0, %v554_v27  ;;  %v466_v51 = vadd.f32 %v2627_v1, %v463_v14  ;;  %1152 = vmatpush.msra.mxu0 %v1524_v32  ;;  %v474_v9 = vadd.f32 %v473_v22, %v459_v6 }
  0xd1   :  { %v2826_v46 = vpop.f32.mrf.mxu0  ;;  %v2828_v50 = vpop.f32.mrf.mxu3  ;;  %v664_v20 = vadd.f32 %v663_v23, %v2692_v55  ;;  %v669_v29 = vmul.f32 %v3417_v53, %v2653_v43  ;;  %1254 = vmatpush.msra.mxu1 %v1551_v36 }
  0xd2   :  { %v471_v14 = vmul.f32 %v470_v58, %v2826_v46  ;;  %v551_v0 = vmul.f32 %v550_v62, %v2826_v46  ;;  %v672_v6 = vmul.f32 %v671_v63, %v2826_v46  ;;  %v2855_v22 = vmul.f32 %v773_v3, %v2826_v46 }
  0xd3   :  { %v2841_v27 = vpop.f32.mrf.mxu1  ;;  %v2860_v55 = vmul.f32 %v875_v4, %v2826_v46  ;;  %v2865_v1 = vmul.f32 %v977_v13, %v2826_v46  ;;  %v2870_v21 = vmul.f32 %v3415_v15, %v2826_v46  ;;  %v2875_v23 = vmul.f32 %v3416_v19, %v2826_v46 }
  0xd4   :  { %v481_v32 = vmul.f32 %v470_v58, %v2841_v27  ;;  %v561_v36 = vmul.f32 %v550_v62, %v2841_v27  ;;  %v2886_v60 = vmul.f32 %v671_v63, %v2841_v27  ;;  %v2891_v15 = vmul.f32 %v773_v3, %v2841_v27 }
  0xd5   :  { %v2896_v19 = vmul.f32 %v875_v4, %v2841_v27  ;;  %v549_v47 = vadd.f32 %v548_v37, %v546_v16  ;;  %v558_v58 = vadd.f32 %v557_v56, %v556_v57  ;;  %v559_v25 = vmul.f32 %v547_v61, %v2826_v46 }
  0xd6   :  { %v2904_v62 = vmul.f32 %v977_v13, %v2841_v27  ;;  %v469_v3 = vadd.f32 %v2756_v49, %v466_v51  ;;  %v476_v53 = vadd.f32 %v2674_v28, %v474_v9  ;;  %v479_v4 = vmul.f32 %v467_v35, %v2826_v46 }
  0xd7   :  { %v2906_v63 = vpop.f32.mrf.mxu2  ;;  %v552_v37 = vadd.f32 %v551_v0, %v549_v47  ;;  %v560_v56 = vadd.f32 %v559_v25, %v558_v58  ;;  %v572_v61 = vmul.f32 %v571_v39, %v2828_v50  ;;  %v583_v13 = vmul.f32 %v568_v38, %v2828_v50 }
  0xd8   :  { %v575_v16 = vmul.f32 %v574_v44, %v2906_v63  ;;  %v472_v51 = vadd.f32 %v471_v14, %v469_v3  ;;  %v478_v28 = vadd.f32 %v477_v8, %v476_v53  ;;  %v492_v35 = vmul.f32 %v491_v45, %v2828_v50 }
  0xd9   :  { %v562_v47 = vadd.f32 %v561_v36, %v560_v56  ;;  %v570_v25 = vadd.f32 %v569_v31, %v552_v37  ;;  %v585_v9 = vmul.f32 %v571_v39, %v2906_v63  ;;  %v495_v38 = vmul.f32 %v494_v5, %v2906_v63 }
  0xda   :  { %v2925_v49 = vpop.f32.mrf.mxu3  ;;  %v480_v57 = vadd.f32 %v479_v4, %v478_v28  ;;  %v490_v14 = vadd.f32 %v2789_v30, %v472_v51  ;;  %v503_v53 = vmul.f32 %v488_v34, %v2828_v50  ;;  %v505_v8 = vmul.f32 %v491_v45, %v2906_v63 }
  0xdb   :  { %v573_v31 = vadd.f32 %v572_v61, %v570_v25  ;;  %v3505_v0 = vstv %s3502_s10  ;;  %v584_v36 = vadd.f32 %v583_v13, %v562_v47  ;;  %v587_v58 = vmul.f32 %v574_v44, %v2925_v49  ;;  %s3201_s10 = sld [smem:[#allocation2 + $0x42]] }
  0xdc   :  { %v578_v39 = vmul.f32 %v3505_v0, %v2925_v49  ;;  %v482_v3 = vadd.f32 %v481_v32, %v480_v57  ;;  %v493_v4 = vadd.f32 %v492_v35, %v490_v14  ;;  %v667_v30 = vadd.f32 %v2679_v26, %v664_v20 }
  0xdd   :  { %v3506_v34 = vstv %s3503_s15  ;;  %v576_v56 = vadd.f32 %v575_v16, %v573_v31  ;;  %v586_v45 = vadd.f32 %v585_v9, %v584_v36  ;;  %v498_v61 = vmul.f32 %v497_v54, %v2925_v49  ;;  %s3206_s15 = sld [smem:[#allocation2 + $0x43]] }
  0xde   :  { %v674_v37 = vmul.f32 %v3506_v34, %v2663_v12  ;;  %v507_v13 = vmul.f32 %v494_v5, %v2925_v49  ;;  %v504_v44 = vadd.f32 %v503_v53, %v482_v3  ;;  %v670_v32 = vadd.f32 %v669_v29, %v667_v30 }
  0xdf   :  { %v3507_v20 = vstv %s3504_s7  ;;  %v579_v16 = vadd.f32 %v578_v39, %v576_v56  ;;  %v588_v28 = vadd.f32 %v587_v58, %v586_v45  ;;  %v496_v35 = vadd.f32 %v495_v38, %v493_v4  ;;  %s3542_s7 = sld [smem:[#allocation26_spill]] }
  0xe0   :  { %v675_v26 = vadd.f32 %v674_v37, %v660_v11  ;;  %v678_v51 = vmul.f32 %v3507_v20, %v2653_v43  ;;  %v3508_v47 = vstv %s2529_s23  ;;  %v506_v5 = vadd.f32 %v505_v8, %v504_v44  ;;  %s2993_s23 = sld [smem:[#allocation2 + $0x24]] }
  0xe1   :  { %v680_v25 = vmul.f32 %v3508_v47, %v2826_v46  ;;  %v2964_v9 = vpop.f32.mrf.mxu0  ;;  %v673_v57 = vadd.f32 %v672_v6, %v670_v32  ;;  %v3509_v14 = vstv %s2630_s24  ;;  %v3510_v53 = vstv %s2598_s4  ;;  %s3518_s4 = sld [smem:[#allocation50_spill]] }
  0xe2   :  { %v677_v29 = vadd.f32 %v2684_v59, %v675_v26  ;;  %v693_v11 = vmul.f32 %v3509_v14, %v2828_v50  ;;  %v581_v31 = vmul.f32 %v3510_v53, %v2964_v9  ;;  %v3511_v38 = vmov %v3505_v0 }
  0xe3   :  { %v589_v0 = vmul.f32 %v3511_v38, %v2964_v9  ;;  %v3512_v39 = vstv %s2607_s26  ;;  %v509_v6 = vmul.f32 %v497_v54, %v2964_v9  ;;  %v508_v59 = vadd.f32 %v507_v13, %v506_v5  ;;  %v1469_v54 = vld [vmem:[%s3328_s6 + $0x218] sm:$0xff]  ;;  %s3021_s26 = sld [smem:[#allocation2 + $0x26]] }
  0xe4   :  { %v501_v36 = vmul.f32 %v3512_v39, %v2964_v9  ;;  %v679_v8 = vadd.f32 %v678_v51, %v677_v29  ;;  %v691_v58 = vadd.f32 %v2797_v33, %v673_v57  ;;  %v3513_v3 = vstv %s2643_s14  ;;  %v2988_v30 = vpop.f32.mrf.mxu1  ;;  %v1496_v33 = vld [vmem:[%s3328_s6 + $0x298] sm:$0xff]  ;;  %949 = vmatpush.msra.mxu2 %v1469_v54  ;;  %s3142_s14 = sld [smem:[#allocation2 + $0x35]] }
  0xe5   :  { %v696_v4 = vmul.f32 %v3513_v3, %v2906_v63  ;;  %v582_v34 = vadd.f32 %v581_v31, %v579_v16  ;;  %v590_v37 = vadd.f32 %v589_v0, %v588_v28  ;;  %v499_v56 = vadd.f32 %v498_v61, %v496_v35  ;;  %v1523_v13 = vld [vmem:[%s3328_s6 + $0x318] sm:$0xff]  ;;  %1051 = vmatpush.msra.mxu3 %v1496_v33 }
  0xe6   :  { %v3514_v45 = vstv %s2686_s11  ;;  %v3515_v61 = vmov %v3510_v53  ;;  %v510_v26 = vadd.f32 %v509_v6, %v508_v59  ;;  %v3516_v20 = vmov %v3512_v39  ;;  %v1550_v28 = vld [vmem:[%s3328_s6 + $0x398] sm:$0xff]  ;;  %v1495_v53 = vld [vmem:[%s3328_s6 + $0x290] sm:$0xff]  ;;  %1153 = vmatpush.msra.mxu0 %v1523_v13 }
  0xe7   :  { %v699_v44 = vmul.f32 %v3514_v45, %v2925_v49  ;;  %v591_v32 = vmul.f32 %v3515_v61, %v2988_v30  ;;  %v511_v51 = vmul.f32 %v3516_v20, %v2988_v30  ;;  %v681_v16 = vadd.f32 %v680_v25, %v679_v8  ;;  %v1468_v25 = vld [vmem:[%s3328_s6 + $0x210] sm:$0xff]  ;;  %1255 = vmatpush.msra.mxu1 %v1550_v28  ;;  %v1467_v45 = vld [vmem:[%s3328_s6 + $0x208] sm:$0xff] }
  0xe8   :  { %v502_v35 = vadd.f32 %v501_v36, %v499_v56  ;;  %v694_v47 = vadd.f32 %v693_v11, %v691_v58  ;;  %v3517_v5 = vstv %s2708_s8  ;;  %v3519_v29 = vstv %s3485_s9  ;;  %s3033_s9 = sld [smem:[#allocation2 + $0x27]]  ;;  %v1522_v36 = vld [vmem:[%s3328_s6 + $0x310] sm:$0xff]  ;;  %950 = vmatpush.msra.mxu2 %v1468_v25  ;;  %1052 = vmatpush.msra.mxu3 %v1495_v53  ;;  %v1494_v61 = vld [vmem:[%s3328_s6 + $0x288] sm:$0xff] }
  0xe9   :  { %v702_v57 = vmul.f32 %v3517_v5, %v2964_v9  ;;  %v704_v14 = vmul.f32 %v3519_v29, %v2828_v50  ;;  %v592_v11 = vadd.f32 %v591_v32, %v590_v37  ;;  %v512_v31 = vadd.f32 %v511_v51, %v510_v26  ;;  %v1549_v56 = vld [vmem:[%s3328_s6 + $0x390] sm:$0xff]  ;;  %1154 = vmatpush.msra.mxu0 %v1522_v36 }
  0xea   :  { %v683_v38 = vadd.f32 %v2886_v60, %v681_v16  ;;  %v3520_v0 = vstv %s2630_s24  ;;  %v697_v6 = vadd.f32 %v696_v4, %v694_v47  ;;  %v3521_v59 = vmov %v3513_v3  ;;  %1256 = vmatpush.msra.mxu1 %v1549_v56  ;;  %951 = vmatpush.msra.mxu2 %v1467_v45  ;;  %s3232_s24 = sld [smem:[#allocation2 + $0x48]] }
  0xeb   :  { %v706_v39 = vmul.f32 %v3520_v0, %v2906_v63  ;;  %v708_v8 = vmul.f32 %v3521_v59, %v2925_v49  ;;  %v3522_v58 = vstv %s3518_s4  ;;  %v3523_v60 = vstv %s2727_s22  ;;  %1053 = vmatpush.msra.mxu3 %v1494_v61  ;;  %v1548_v0 = vld [vmem:[%s3328_s6 + $0x388] sm:$0xff]  ;;  %s3193_s4 = sld [smem:[#allocation2 + $0x3f]] }
  0xec   :  { %v765_v3 = vmul.f32 %v3522_v58, %v2663_v12  ;;  %v768_v37 = vmul.f32 %v3523_v60, %v2593_v41  ;;  %v593_v4 = vmax.f32 %v582_v34, %v592_v11  ;;  %v513_v54 = vmax.f32 %v502_v35, %v512_v31  ;;  %1257 = vmatpush.msra.mxu1 %v1548_v0  ;;  %s3212_s22 = sld [smem:[#allocation2 + $0x44]] }
  0xed   :  { %v705_v33 = vadd.f32 %v704_v14, %v683_v38  ;;  %v770_v13 = vstv %s2970_s29  ;;  %v3525_v32 = vstv %s2686_s11  ;;  %v3527_v51 = vstv %s3524_s3  ;;  %s3067_s29 = sld [smem:[#allocation2 + $0x2a]] }
  0xee   :  { %v710_v26 = vmul.f32 %v3525_v32, %v2964_v9  ;;  %v766_v20 = vadd.f32 %v765_v3, %v2696_v10  ;;  %v771_v34 = vmul.f32 %v770_v13, %v2653_v43  ;;  %v776_v16 = vmul.f32 %v3527_v51, %v2663_v12  ;;  %v1521_v10 = vld [vmem:[%s3328_s6 + $0x308] sm:$0xff]  ;;  %v1493_v3 = vld [vmem:[%s3328_s6 + $0x280] sm:$0xff]  ;;  %s3168_s11 = sld [smem:[#allocation2 + $0x3b]] }
  0xef   :  { %v594_v28 = vmax.f32 %v593_v4, 0.0  ;;  %v514_v35 = vmax.f32 %v513_v54, 0.0  ;;  %v707_v47 = vadd.f32 %v706_v39, %v705_v33  ;;  %v3528_v5 = vmov %v3522_v58  ;;  %v1466_v39 = vld [vmem:[%s3328_s6 + $0x200] sm:$0xff]  ;;  %1155 = vmatpush.msra.mxu0 %v1521_v10  ;;  %1054 = vmatpush.msra.mxu3 %v1493_v3  ;;  %s3228_s3 = sld [smem:[#allocation2 + $0x45]] }
  0xf0   :  { %v778_v29 = vmul.f32 %v3528_v5, %v2593_v41  ;;  %v700_v14 = vadd.f32 %v699_v44, %v697_v6  ;;  %v769_v25 = vadd.f32 %v768_v37, %v766_v20  ;;  %v3529_v53 = vstv %s3526_s19  ;;  %952 = vmatpush.msra.mxu2 %v1466_v39  ;;  %s3161_s19 = sld [smem:[#allocation2 + $0x3a]] }
  0xf1   :  { %v777_v11 = vadd.f32 %v776_v16, %v3529_v53  ;;  %v3530_v31 = vmov %v3523_v60  ;;  %628 = vmatmul.f32.vlgmr.msrb.gmra.mxu2 %v594_v28  ;;  %648 = vmatmul.f32.vlgmr.msrb.gmra.mxu3 %v514_v35  ;;  %v709_v44 = vadd.f32 %v708_v8, %v707_v47  ;;  %v3531_v36 = vstv %s2708_s8  ;;  %v1520_v8 = vld [vmem:[%s3328_s6 + $0x300] sm:$0xff]  ;;  %s3250_s8 = sld [smem:[#allocation2 + $0x4c]] }
  0xf2   :  { %v780_v38 = vmul.f32 %v3530_v31, %v2653_v43  ;;  %v712_v6 = vmul.f32 %v3531_v36, %v2988_v30  ;;  %v794_v59 = vstv %s2993_s23  ;;  %v797_v58 = vstv %s3010_s20  ;;  %s3108_s20 = sld [smem:[#allocation2 + $0x2f]]  ;;  %1156 = vmatpush.msra.mxu0 %v1520_v8 }
  0xf3   :  { %v703_v60 = vadd.f32 %v702_v57, %v700_v14  ;;  %v772_v37 = vadd.f32 %v771_v34, %v769_v25  ;;  %v779_v56 = vadd.f32 %v778_v29, %v777_v11  ;;  %v782_v45 = vmul.f32 %v770_v13, %v2826_v46  ;;  %v1547_v57 = vld [vmem:[%s3328_s6 + $0x380] sm:$0xff]  ;;  %s3120_s6 = sld [smem:[#allocation2 + $0x31]] }
  0xf4   :  { %v711_v4 = vadd.f32 %v710_v26, %v709_v44  ;;  %v795_v54 = vmul.f32 %v794_v59, %v2828_v50  ;;  %v800_v33 = vstv %s3021_s26  ;;  %v803_v61 = vstv %s3033_s9  ;;  %s3115_s26 = sld [smem:[#allocation2 + $0x30]]  ;;  %1258 = vmatpush.msra.mxu1 %v1547_v57 }
  0xf5   :  { %v775_v13 = vadd.f32 %v2855_v22, %v772_v37  ;;  %v781_v32 = vadd.f32 %v780_v38, %v779_v56  ;;  %v798_v20 = vmul.f32 %v797_v58, %v2906_v63  ;;  %v3532_v26 = vstv %s3486_s13  ;;  %s3533_s9 = sld [smem:[#allocation22_spill]] }
  0xf6   :  { %v806_v34 = vmul.f32 %v3532_v26, %v2828_v50  ;;  %v713_v51 = vadd.f32 %v712_v6, %v711_v4  ;;  %v801_v16 = vmul.f32 %v800_v33, %v2925_v49  ;;  %v804_v28 = vmul.f32 %v803_v61, %v2964_v9  ;;  %s3534_s13 = sld [smem:[#allocation21_spill]] }
  0xf7   :  { %v808_v35 = vmul.f32 %v794_v59, %v2906_v63  ;;  %v783_v22 = vadd.f32 %v782_v45, %v781_v32  ;;  %v793_v47 = vadd.f32 %v2802_v2, %v775_v13  ;;  %v810_v5 = vmul.f32 %v797_v58, %v2925_v49  ;;  %s3550_s23 = sld [smem:[#allocation27_spill]] }
  0xf8   :  { %v866_v29 = vstv %s3057_s2  ;;  %v714_v10 = vmax.f32 %v703_v60, %v713_v51  ;;  %v869_v25 = vstv %s3067_s29  ;;  %v872_v53 = vstv %s3075_s1  ;;  %s3156_s2 = sld [smem:[#allocation2 + $0x39]] }
  0xf9   :  { %v867_v14 = vmul.f32 %v866_v29, %v2663_v12  ;;  %v785_v11 = vadd.f32 %v2891_v15, %v783_v22  ;;  %v796_v31 = vadd.f32 %v795_v54, %v793_v47  ;;  %v870_v38 = vmul.f32 %v869_v25, %v2593_v41  ;;  %s3538_s29 = sld [smem:[#allocation24_spill]] }
  0xfa   :  { %v873_v0 = vmul.f32 %v872_v53, %v2653_v43  ;;  %v715_v2 = vmax.f32 %v714_v10, 0.0  ;;  %v880_v6 = vmul.f32 %v866_v29, %v2593_v41  ;;  %v812_v58 = vmul.f32 %v800_v33, %v2964_v9  ;;  %s3186_s1 = sld [smem:[#allocation2 + $0x3e]] }
  0xfb   :  { %v868_v39 = vadd.f32 %v867_v14, %v2700_v48  ;;  %v3535_v44 = vstv %s3533_s9  ;;  %v799_v15 = vadd.f32 %v798_v20, %v796_v31  ;;  %v807_v59 = vadd.f32 %v806_v34, %v785_v11 }
  0xfc   :  { %v878_v36 = vmul.f32 %v3535_v44, %v2663_v12  ;;  %v882_v3 = vmul.f32 %v869_v25, %v2653_v43  ;;  %749 = vmatmul.f32.vlgmr.msrb.gmra.mxu0 %v715_v2  ;;  %v3536_v48 = vstv %s3534_s13  ;;  %v896_v56 = vstv %s3100_s28  ;;  %s3238_s28 = sld [smem:[#allocation2 + $0x49]] }
  0xfd   :  { %v871_v60 = vadd.f32 %v870_v38, %v868_v39  ;;  %v899_v45 = vstv %s3108_s20  ;;  %v802_v8 = vadd.f32 %v801_v16, %v799_v15  ;;  %v809_v4 = vadd.f32 %v808_v35, %v807_v59  ;;  %s3265_s20 = sld [smem:[#allocation2 + $0x4d]] }
  0xfe   :  { %v879_v37 = vadd.f32 %v878_v36, %v3536_v48  ;;  %v814_v54 = vmul.f32 %v803_v61, %v2988_v30  ;;  %v884_v57 = vmul.f32 %v872_v53, %v2826_v46  ;;  %v902_v33 = vstv %s3115_s26  ;;  %s3284_s26 = sld [smem:[#allocation2 + $0x4e]] }
  0xff   :  { %v874_v13 = vadd.f32 %v873_v0, %v871_v60  ;;  %v905_v20 = vstv %s3120_s6  ;;  %v805_v26 = vadd.f32 %v804_v28, %v802_v8  ;;  %v811_v34 = vadd.f32 %v810_v5, %v809_v4  ;;  %s1546_s6 = sld [smem:[#allocation2 + $0x4f]] }
 0x100   :  { %v881_v32 = vadd.f32 %v880_v6, %v879_v37  ;;  %v897_v51 = vmul.f32 %v896_v56, %v2828_v50  ;;  %v900_v16 = vmul.f32 %v899_v45, %v2906_v63  ;;  %v903_v22 = vmul.f32 %v902_v33, %v2925_v49  ;;  %s3557_s13 = sld [smem:[#allocation52_spill]] }
 0x101   :  { %v877_v61 = vadd.f32 %v2860_v55, %v874_v13  ;;  %v906_v47 = vmul.f32 %v905_v20, %v2964_v9  ;;  %v813_v28 = vadd.f32 %v812_v58, %v811_v34  ;;  %v3537_v5 = vstv %s3487_s0  ;;  %s3181_s0 = sld [smem:[#allocation2 + $0x3d]] }
 0x102   :  { %v883_v35 = vadd.f32 %v882_v3, %v881_v32  ;;  %v908_v29 = vmul.f32 %v3537_v5, %v2828_v50  ;;  %v910_v10 = vmul.f32 %v896_v56, %v2906_v63  ;;  %v912_v14 = vmul.f32 %v899_v45, %v2925_v49 }
 0x103   :  { %v895_v25 = vadd.f32 %v2810_v40, %v877_v61  ;;  %v968_v53 = vstv %s3131_s30  ;;  %v971_v11 = vstv %s3138_s17  ;;  %v815_v31 = vadd.f32 %v814_v54, %v813_v28 }
 0x104   :  { %v885_v55 = vadd.f32 %v884_v57, %v883_v35  ;;  %v969_v38 = vmul.f32 %v968_v53, %v2663_v12  ;;  %v972_v0 = vmul.f32 %v971_v11, %v2593_v41  ;;  %v974_v2 = vstv %s3142_s14  ;;  %s3558_s14 = sld [smem:[#allocation53_spill]] }
 0x105   :  { %v898_v44 = vadd.f32 %v897_v51, %v895_v25  ;;  %v914_v36 = vmul.f32 %v902_v33, %v2964_v9  ;;  %v3540_v6 = vstv %s3538_s29  ;;  %v816_v40 = vmax.f32 %v805_v26, %v815_v31 }
 0x106   :  { %v887_v39 = vadd.f32 %v2896_v19, %v885_v55  ;;  %v980_v15 = vmul.f32 %v3540_v6, %v2663_v12  ;;  %v970_v59 = vadd.f32 %v969_v38, %v2712_v17  ;;  %v975_v58 = vmul.f32 %v974_v2, %v2653_v43 }
 0x107   :  { %v982_v3 = vmul.f32 %v968_v53, %v2593_v41  ;;  %v901_v19 = vadd.f32 %v900_v16, %v898_v44  ;;  %v3541_v48 = vstv %s3539_s5  ;;  %v984_v56 = vmul.f32 %v971_v11, %v2653_v43 }
 0x108   :  { %v909_v60 = vadd.f32 %v908_v29, %v887_v39  ;;  %v981_v37 = vadd.f32 %v980_v15, %v3541_v48  ;;  %v817_v45 = vmax.f32 %v816_v40, 0.0  ;;  %v973_v8 = vadd.f32 %v972_v0, %v970_v59 }
 0x109   :  { %v998_v4 = vstv %s3152_s18  ;;  %v1001_v54 = vstv %s3156_s2  ;;  %v916_v57 = vmul.f32 %v905_v20, %v2988_v30  ;;  %v986_v32 = vmul.f32 %v974_v2, %v2826_v46 }
 0x10a   :  { %v911_v17 = vadd.f32 %v910_v10, %v909_v60  ;;  %v983_v13 = vadd.f32 %v982_v3, %v981_v37  ;;  %851 = vmatmul.f32.vlgmr.msrb.gmra.mxu1 %v817_v45  ;;  %v904_v33 = vadd.f32 %v903_v22, %v901_v19  ;;  %v976_v26 = vadd.f32 %v975_v58, %v973_v8 }
 0x10b   :  { %v1004_v34 = vstv %s3161_s19  ;;  %v1007_v51 = vstv %s3168_s11  ;;  %v999_v35 = vmul.f32 %v998_v4, %v2828_v50  ;;  %v1002_v28 = vmul.f32 %v1001_v54, %v2906_v63  ;;  %s3559_s19 = sld [smem:[#allocation54_spill]]  ;;  %s1658_s11 = smov [#allocation7]  }
 0x10c   :  { %v913_v16 = vadd.f32 %v912_v14, %v911_v17  ;;  %v985_v61 = vadd.f32 %v984_v56, %v983_v13  ;;  %v907_v20 = vadd.f32 %v906_v47, %v904_v33  ;;  %v979_v5 = vadd.f32 %v2865_v1, %v976_v26  ;;  %s1330_s5 = sshll.u32 %s1658_s11, 4  ;;  %s1331_s5 = int_to_ptr.vmem [resolvable:$true] %s1330_s5 }
 0x10d   :  { %v1005_v29 = vmul.f32 %v1004_v34, %v2925_v49  ;;  %v1008_v22 = vmul.f32 %v1007_v51, %v2964_v9  ;;  %v3543_v55 = vstv %s3488_s12  ;;  %v1012_v53 = vmul.f32 %v998_v4, %v2906_v63  ;;  %s3221_s12 = sld [smem:[#allocation2 + $0x47]] }
 0x10e   :  { %v915_v10 = vadd.f32 %v914_v36, %v913_v16  ;;  %v987_v14 = vadd.f32 %v986_v32, %v985_v61  ;;  %v1010_v25 = vmul.f32 %v3543_v55, %v2828_v50  ;;  %v997_v47 = vadd.f32 %v2815_v7, %v979_v5 }
 0x10f   :  { %v1014_v1 = vmul.f32 %v1001_v54, %v2925_v49  ;;  %v1070_v11 = vstv %s3181_s0  ;;  %v1073_v31 = vstv %s3186_s1  ;;  %v1076_v36 = vstv %s3193_s4  ;;  %s1659_s0 = smov [#allocation8]  }
 0x110   :  { %v917_v38 = vadd.f32 %v916_v57, %v915_v10  ;;  %v989_v0 = vadd.f32 %v2904_v62, %v987_v14  ;;  %v1071_v2 = vmul.f32 %v1070_v11, %v2663_v12  ;;  %v1074_v39 = vmul.f32 %v1073_v31, %v2593_v41  ;;  %s1341_s1 = sshll.u32 %s1659_s0, 4  ;;  %s1342_s1 = int_to_ptr.vmem [resolvable:$true] %s1341_s1 }
 0x111   :  { %v1000_v44 = vadd.f32 %v999_v35, %v997_v47  ;;  %v3545_v6 = vstv %s3542_s7  ;;  %v1084_v7 = vmul.f32 %v1070_v11, %v2593_v41  ;;  %v1077_v58 = vmul.f32 %v1076_v36, %v2653_v43  ;;  %s1332_s29 = sshll.u32 %s3559_s19, 4  ;;  %s1333_s29 = int_to_ptr.hbm [resolvable:$true] %s1332_s29 }
 0x112   :  { %v1082_v15 = vmul.f32 %v3545_v6, %v2663_v12  ;;  %v918_v40 = vmax.f32 %v907_v20, %v917_v38  ;;  %v1011_v59 = vadd.f32 %v1010_v25, %v989_v0  ;;  %v1072_v62 = vadd.f32 %v1071_v2, %v2731_v18 }
 0x113   :  { %v1003_v3 = vadd.f32 %v1002_v28, %v1000_v44  ;;  %v1016_v19 = vmul.f32 %v1004_v34, %v2964_v9  ;;  %v3546_v60 = vstv %s3544_s21  ;;  %v1086_v37 = vmul.f32 %v1073_v31, %v2653_v43 }
 0x114   :  { %v1083_v48 = vadd.f32 %v1082_v15, %v3546_v60  ;;  %v919_v56 = vmax.f32 %v918_v40, 0.0  ;;  %v1013_v45 = vadd.f32 %v1012_v53, %v1011_v59  ;;  %v1075_v8 = vadd.f32 %v1074_v39, %v1072_v62 }
 0x115   :  { %v1100_v4 = vstv %s3201_s10  ;;  %v1018_v18 = vmul.f32 %v1007_v51, %v2988_v30  ;;  %v1088_v17 = vmul.f32 %v1076_v36, %v2826_v46  ;;  %v1103_v57 = vstv %s3206_s15  ;;  %s3560_s15 = sld [smem:[#allocation55_spill]] }
 0x116   :  { %v1085_v54 = vadd.f32 %v1084_v7, %v1083_v48  ;;  %953 = vmatmul.f32.vlgmr.msra.gmra.mxu2 %v919_v56  ;;  %v1006_v13 = vadd.f32 %v1005_v29, %v1003_v3  ;;  %v1015_v32 = vadd.f32 %v1014_v1, %v1013_v45  ;;  %v1078_v33 = vadd.f32 %v1077_v58, %v1075_v8 }
 0x117   :  { %v1106_v26 = vstv %s3212_s22  ;;  %v3547_v34 = vstv %s3496_s16  ;;  %v1101_v35 = vmul.f32 %v1100_v4, %v2828_v50  ;;  %v1104_v51 = vmul.f32 %v1103_v57, %v2906_v63  ;;  %s3549_s16 = sld [smem:[#allocation28_spill]] }
 0x118   :  { %v1090_v16 = vmul.f32 %v3547_v34, %v2841_v27  ;;  %v1087_v61 = vadd.f32 %v1086_v37, %v1085_v54  ;;  %v1009_v28 = vadd.f32 %v1008_v22, %v1006_v13  ;;  %v1017_v20 = vadd.f32 %v1016_v19, %v1015_v32 }
 0x119   :  { %v1081_v5 = vadd.f32 %v2870_v21, %v1078_v33  ;;  %v1107_v29 = vmul.f32 %v1106_v26, %v2925_v49  ;;  %v1109_v14 = vstv %s3228_s3  ;;  %v3548_v55 = vstv %s3489_s27  ;;  %s3551_s27 = sld [smem:[#allocation36_spill]] }
 0x11a   :  { %v1089_v10 = vadd.f32 %v1088_v17, %v1087_v61  ;;  %v1112_v25 = vmul.f32 %v3548_v55, %v2828_v50  ;;  %v1114_v53 = vmul.f32 %v1100_v4, %v2906_v63  ;;  %v1019_v47 = vadd.f32 %v1018_v18, %v1017_v20 }
 0x11b   :  { %v1099_v1 = vadd.f32 %v2820_v42, %v1081_v5  ;;  %v1116_v11 = vmul.f32 %v1103_v57, %v2925_v49  ;;  %v1172_v31 = vstv %s3221_s12  ;;  %v1175_v21 = vstv %s3232_s24  ;;  %s1343_s7 = sshll.u32 %s3560_s15, 4  ;;  %s1344_s7 = int_to_ptr.hbm [resolvable:$true] %s1343_s7 }
 0x11c   :  { %v1091_v22 = vadd.f32 %v1090_v16, %v1089_v10  ;;  %v1173_v38 = vmul.f32 %v1172_v31, %v2663_v12  ;;  %v1178_v0 = vstv %s3238_s28  ;;  %v1020_v2 = vmax.f32 %v1009_v28, %v1019_v47 }
 0x11d   :  { %v1102_v39 = vadd.f32 %v1101_v35, %v1099_v1  ;;  %v1176_v44 = vmul.f32 %v1175_v21, %v2593_v41  ;;  %v1179_v36 = vmul.f32 %v1178_v0, %v2653_v43  ;;  %v3552_v15 = vstv %s3549_s16 }
 0x11e   :  { %v1113_v42 = vadd.f32 %v1112_v25, %v1091_v22  ;;  %v1174_v6 = vadd.f32 %v1173_v38, %v2735_v24  ;;  %v1184_v7 = vmul.f32 %v3552_v15, %v2663_v12  ;;  %v1186_v40 = vmul.f32 %v1172_v31, %v2593_v41 }
 0x11f   :  { %v1021_v59 = vmax.f32 %v1020_v2, 0.0  ;;  %v1105_v62 = vadd.f32 %v1104_v51, %v1102_v39  ;;  %v1118_v58 = vmul.f32 %v1106_v26, %v2964_v9  ;;  %v1188_v3 = vmul.f32 %v1175_v21, %v2653_v43 }
 0x120   :  { %v1115_v19 = vadd.f32 %v1114_v53, %v1113_v42  ;;  %v1177_v60 = vadd.f32 %v1176_v44, %v1174_v6  ;;  %v3553_v48 = vstv %s3550_s23  ;;  %v1202_v56 = vstv %s3250_s8 }
 0x121   :  { %v1185_v37 = vadd.f32 %v1184_v7, %v3553_v48  ;;  %v3554_v45 = vstv %s3551_s27  ;;  %1055 = vmatmul.f32.vlgmr.msra.gmra.mxu3 %v1021_v59  ;;  %v1110_v12 = vmul.f32 %v1109_v14, %v2964_v9  ;;  %v1120_v41 = vmul.f32 %v1109_v14, %v2988_v30 }
 0x122   :  { %v1200_v24 = vmul.f32 %v3554_v45, %v2759_v52  ;;  %v1117_v8 = vadd.f32 %v1116_v11, %v1115_v19  ;;  %v1180_v4 = vadd.f32 %v1179_v36, %v1177_v60  ;;  %v1190_v18 = vmul.f32 %v1178_v0, %v2826_v46 }
 0x123   :  { %v1187_v43 = vadd.f32 %v1186_v40, %v1185_v37  ;;  %v3555_v54 = vstv %s3497_s25  ;;  %v1108_v57 = vadd.f32 %v1107_v29, %v1105_v62  ;;  %v1203_v52 = vmul.f32 %v1202_v56, %v2828_v50 }
 0x124   :  { %v1192_v17 = vmul.f32 %v3555_v54, %v2841_v27  ;;  %v1119_v13 = vadd.f32 %v1118_v58, %v1117_v8  ;;  %v1183_v32 = vadd.f32 %v2875_v23, %v1180_v4  ;;  %v1205_v26 = vstv %s3265_s20 }
 0x125   :  { %v1189_v33 = vadd.f32 %v1188_v3, %v1187_v43  ;;  %v1111_v34 = vadd.f32 %v1110_v12, %v1108_v57  ;;  %v3556_v51 = vmov %v3554_v45  ;;  %v1206_v28 = vmul.f32 %v1205_v26, %v2906_v63  ;;  %v1567_v3 = vld [vmem:[%s3557_s13] ss:$0 sm:$0xff] }
 0x126   :  { %v1121_v16 = vadd.f32 %v1120_v41, %v1119_v13  ;;  %v1201_v35 = vadd.f32 %v1200_v24, %v1183_v32  ;;  %v1214_v46 = vmul.f32 %v3556_v51, %v2828_v50  ;;  %v1216_v29 = vmul.f32 %v1202_v56, %v2906_v63 }
 0x127   :  { %v1191_v61 = vadd.f32 %v1190_v18, %v1189_v33  ;;  %v1208_v10 = vstv %s3284_s26  ;;  %v1218_v23 = vmul.f32 %v1205_v26, %v2925_v49  ;;  %v1211_v25 = vstv %s1546_s6 }
 0x128   :  { %v1122_v27 = vmax.f32 %v1111_v34, %v1121_v16  ;;  %v1204_v5 = vadd.f32 %v1203_v52, %v1201_v35  ;;  %v1209_v47 = vmul.f32 %v1208_v10, %v2925_v49  ;;  %v1220_v50 = vmul.f32 %v1208_v10, %v2964_v9 }
 0x129   :  { %v1193_v20 = vadd.f32 %v1192_v17, %v1191_v61  ;;  %v1212_v11 = vmul.f32 %v1211_v25, %v2964_v9  ;;  %v1222_v22 = vmul.f32 %v1211_v25, %v2988_v30 }
 0x12a   :  { %v1123_v14 = vmax.f32 %v1122_v27, 0.0  ;;  %v1207_v53 = vadd.f32 %v1206_v28, %v1204_v5 }
 0x12b   :  { %v1215_v55 = vadd.f32 %v1214_v46, %v1193_v20 }
 0x12c   :  { %1157 = vmatmul.f32.vlgmr.msra.gmra.mxu0 %v1123_v14  ;;  %v1210_v38 = vadd.f32 %v1209_v47, %v1207_v53 }
 0x12d   :  { %v1217_v1 = vadd.f32 %v1216_v29, %v1215_v55  ;;  %v1308_v29 = vld [vmem:[%s3558_s14] sm:$0xf] }
 0x12e   :  { %v1213_v21 = vadd.f32 %v1212_v11, %v1210_v38 }
 0x12f   :  { %v1219_v31 = vadd.f32 %v1218_v23, %v1217_v1 }
 0x131   :  { %v1221_v63 = vadd.f32 %v1220_v50, %v1219_v31 }
 0x133   :  { %v1223_v0 = vadd.f32 %v1222_v22, %v1221_v63 }
 0x135   :  { %v1224_v2 = vmax.f32 %v1213_v21, %v1223_v0 }
 0x137   :  { %v1225_v39 = vmax.f32 %v1224_v2, 0.0 }
 0x139   :  { %1259 = vmatmul.f32.vlgmr.msra.gmra.mxu1 %v1225_v39 }
 0x174   :  { %v629_v44 = vpop.f32.mrf.mxu2  ;;  %v649_v36 = vpop.f32.mrf.mxu3 }
 0x175   :  { %v650_v42 = vadd.f32 %v649_v36, %v629_v44 }
 0x179   :  { %v750_v6 = vpop.f32.mrf.mxu0 }
 0x17a   :  { %v753_v49 = vadd.f32 %v750_v6, %v650_v42 }
 0x187   :  { %v852_v15 = vpop.f32.mrf.mxu1 }
 0x188   :  { %v855_v40 = vadd.f32 %v852_v15, %v753_v49 }
 0x199   :  { %v954_v7 = vpop.f32.mrf.mxu2 }
 0x19a   :  { %v957_v59 = vadd.f32 %v954_v7, %v855_v40 }
 0x1a4   :  { %v1056_v9 = vpop.f32.mrf.mxu3 }
 0x1a5   :  { %v1059_v62 = vadd.f32 %v1056_v9, %v957_v59 }
 0x1a9   :  { %v1158_v58 = vpop.f32.mrf.mxu0 }
 0x1aa   :  { %v1161_v30 = vadd.f32 %v1158_v58, %v1059_v62 }
 0x1b6   :  { %v1260_v19 = vpop.f32.mrf.mxu1 }
 0x1b7   :  { %v1263_v60 = vadd.f32 %v1260_v19, %v1161_v30 }
 0x1b9   :  { %v1268_v48 = vadd.f32 %v1567_v3, %v1263_v60 }
 0x1bb   :  { %v1270_v37 = vsel %vm1269_vm1, %v1268_v48, -inf }
 0x1bc   :  { %1271 = vmax.xlane.f32.xlu0 %v1270_v37 }
 0x22f   :  { %v1272_v56 = vpop.xlane.xlu0 %1271 }
 0x230   :  { %v1273_v45 = vsub.f32 %v1268_v48, %v1272_v56 }
 0x232   :  { %v1274_v24 = vmul.f32 1.442695, %v1273_v45 }
 0x234   :  { %1568 = vpow2.f32 %v1274_v24 }
 0x23a   :  { %v1569_v12 = vpop.eup %1568 }
 0x23b   :  { %v1276_v41 = vsel %vm1269_vm1, %v1569_v12, 0.0 }
 0x23c   :  { %1277 = vadd.xlane.f32.xlu0 %v1276_v41 }
 0x2af   :  { %v1278_v8 = vpop.xlane.xlu0 %1277 }
 0x2b0   :  { %1570 = vrcp.f32 %v1278_v8  ;;  %v1290_v54 = vand.u32 2147483648, %v1278_v8  ;;  %v1288_v57 = vand.u32 2147483647, %v1278_v8  ;;  %vm1284_vm3 = vweird.f32 %v1278_v8 }
 0x2b2   :  { %v1291_v13 = vor.u32 1.1754944e-38, %v1290_v54  ;;  %vm1289_vm5 = vcmp.eq.f32.partialorder %v1288_v57, 8.507059e+37 }
 0x2b6   :  { %v1571_v4 = vpop.eup %1570 }
 0x2b7   :  { %v1280_v43 = vmul.f32 %v1571_v4, %v1278_v8  ;;  %vm1285_vm2 = vweird.f32 %v1571_v4 }
 0x2b8   :  { %vm1286_vm4 = vmor %vm1284_vm3, %vm1285_vm2 }
 0x2b9   :  { %v1281_v18 = vsub.f32 1.0, %v1280_v43 }
 0x2bb   :  { %v1282_v17 = vmul.f32 %v1571_v4, %v1281_v18 }
 0x2bd   :  { %v1283_v52 = vadd.f32 %v1571_v4, %v1282_v17 }
 0x2bf   :  { %v1287_v32 = vsel %vm1286_vm4, %v1571_v4, %v1283_v52 }
 0x2c0   :  { %v1292_v33 = vsel %vm1289_vm5, %v1291_v13, %v1287_v32 }
 0x2c1   :  { %v1293_v26 = vmul.f32 %v1569_v12, %v1292_v33 }
 0x2c3   :  { %v1295_v34 = vsel %vm1269_vm1, %v1293_v26, -inf  ;;  %1294 = vst.msk [vmem:[#allocation7] sm:$0xf] %vm1269_vm1, %v1293_v26 }
 0x2c4   :  { %1296 = vmax.xlane.f32.xlu1 %v1295_v34  ;;  %1335 = dma.vmem_to_hbm [thread:$0]  %s1331_s5, 64, %s1333_s29, [#allocation3]  }
 0x337   :  { %v1297_v16 = vpop.xlane.xlu1 %1296 }
 0x338   :  { %v1298_v61 = vsub.f32 %v1293_v26, %v1297_v16 }
 0x33a   :  { %v1299_v35 = vmul.f32 1.442695, %v1298_v61 }
 0x33c   :  { %1572 = vpow2.f32 %v1299_v35 }
 0x342   :  { %v1573_v51 = vpop.eup %1572 }
 0x343   :  { %v1301_v46 = vsel %vm1269_vm1, %v1573_v51, 0.0 }
 0x344   :  { %1302 = vadd.xlane.f32.xlu1 %v1301_v46 }
 0x3b7   :  { %v1303_v28 = vpop.xlane.xlu1 %1302 }
 0x3b8   :  { %1574 = vlog2.f32 %v1303_v28 }
 0x3be   :  { %v1575_v27 = vpop.eup %1574 }
 0x3bf   :  { %v1305_v20 = vmul.f32 0.6931472, %v1575_v27 }
 0x3c1   :  { %v1306_v5 = vadd.f32 %v1305_v20, %v1297_v16 }
 0x3c3   :  { %v1307_v10 = vsub.f32 %v1293_v26, %v1306_v5 }
 0x3c5   :  { %v1309_v14 = vmul.f32 %v1308_v29, %v1307_v10 }
 0x3c7   :  { %v1310_v55 = vsel %vm1269_vm1, %v1309_v14, 0.0 }
 0x3c8   :  { %1311 = vadd.xlane.f32.xlu2 %v1310_v55 }
 0x43b   :  { %v1312_v23 = vpop.xlane.xlu2 %1311 }
 0x43c   :  { %v1313_v25 = vsub.f32 0.0, %v1312_v23 }
 0x43e   :  { %v1315_v53 = vsel %vm1314_vm6, %v1313_v25, 0.0 }
 0x43f   :  { %v1316_v47 = vrot.slane %v1315_v53, 4 }
 0x441   :  { %v1317_v1 = vadd.f32 %v1316_v47, %v1315_v53 }
 0x443   :  { %v1318_v50 = vrot.slane %v1317_v1, 2 }
 0x445   :  { %v1319_v11 = vadd.f32 %v1318_v50, %v1317_v1 }
 0x447   :  { %v1320_v31 = vrot.slane %v1319_v11, 1 }
 0x449   :  { %v1321_v22 = vadd.f32 %v1320_v31, %v1319_v11 }
 0x44b   :  { %v1322_v38 = vmul.f32 0.25, %v1321_v22 }
 0x44d   :  { %1324 = vst.msk [vmem:[#allocation8] sm:$0x1] %vm1323_vm7, %v1322_v38 }
 0x44e   :  { %1346 = dma.vmem_to_hbm [thread:$0]  %s1342_s1, 16, %s1344_s7, [#allocation9]  }
 0x44f   :  { %1652 = dma.done.wait [#allocation3], 64  }
 0x450   :  { %1653 = vsyncadd [#allocation3], 4294967232 }
 0x451   :  { %1654 = dma.done.wait [#allocation9], 16  }
 0x452   :  { %1655 = vsyncadd [#allocation9], 4294967280 }
 0x453   :  { %1355 = vsyncpa [#allocation3], 1 }
 0x454   :  { %1356 = vsyncpa [#allocation9], 1 }
 0x455   :  { %1357 = vsyncpa [#allocation4], 1 }
 0x456   :  { %1358 = vsyncpa [#allocation6], 1 }

</bundles_post_ra>
